<compile_context>
chip_gen: v6e
topology: v6e:2x2x1
jax: 0.10.0
libtpu: 0.0.40
codegen_flags: <defaults>
</compile_context>

<pallas_src>
import functools

import jax
import jax.numpy as jnp
from jax.experimental import pallas as pl
from jax.experimental.pallas import tpu as pltpu

_LANE = 128      # lane width (last dim)
_SUBLANE = 8     # f32 sublane width (second-last dim)


def _round_up(n, m):
    return ((n + m - 1) // m) * m


def _largest_divisor_leq(n, cap):
    cap = max(1, min(n, cap))
    for d in range(cap, 0, -1):
        if n % d == 0:
            return d
    return 1


def _gru_kernel(x_ref, wih_ref, whh_ref, gib_ref, bhn_ref, w_out_ref, b_out_ref,
                out_ref, gi_scr, seq_scr,
                *, num_layers, seq_len, t_block, b_pad, h_pad):
    """One grid step == one GRU layer.  Scratch persists across layers:
      gi_scr  (TB*Bp, 3*Hp) f32 : hoisted input-projection gates for one time block
      seq_scr (T*Bp, Hp)  cd    : this layer's hidden states / next layer's input
    """
    layer = pl.program_id(0)
    cd = wih_ref.dtype                       # matmul operand dtype (f32 or bf16)
    tbp = t_block * b_pad
    n_blocks = seq_len // t_block

    gib = gib_ref[...]                                           # (1, 3*Hp)
    bhn = jnp.broadcast_to(bhn_ref[...], (b_pad, h_pad)).astype(jnp.float32)

    def block_body(blk, h):
        row0 = pl.multiple_of(blk * tbp, tbp)

        # Hoisted input projection for this time block: one big MXU matmul
        # covering t_block steps.  Layer 0 reads x; later layers read the
        # previous layer's hidden states already sitting in seq_scr.
        @pl.when(layer == 0)
        def _():
            cur = x_ref[pl.ds(row0, tbp), :]
            gi_scr[...] = (
                jnp.dot(cur, wih_ref[...], preferred_element_type=jnp.float32) + gib)

        @pl.when(layer > 0)
        def _():
            cur = seq_scr[pl.ds(row0, tbp), :]
            gi_scr[...] = (
                jnp.dot(cur, wih_ref[:h_pad, :], preferred_element_type=jnp.float32)
                + gib)

        def step(s, h):
            grow = pl.multiple_of(s * b_pad, b_pad)
            gi = gi_scr[pl.ds(grow, b_pad), :]                   # (Bp, 3*Hp)
            h_cd = h.astype(cd)
            # TODO(synk): hold W_hh stationary in the MXU across the time loop
            # (pltpu.matmul_push_rhs/acc_lhs/pop) to avoid re-pushing the RHS
            # for an 8-row LHS every step.
            gh_rz = jnp.dot(h_cd, whh_ref[:, :2 * h_pad],
                            preferred_element_type=jnp.float32)
            r = jax.nn.sigmoid(gi[:, :h_pad] + gh_rz[:, :h_pad])
            z = jax.nn.sigmoid(gi[:, h_pad:2 * h_pad] + gh_rz[:, h_pad:])
            gh_n = jnp.dot(h_cd, whh_ref[:, 2 * h_pad:],
                           preferred_element_type=jnp.float32) + bhn
            n = jnp.tanh(gi[:, 2 * h_pad:] + r * gh_n)
            h_new = n + z * (h - n)                              # == (1-z)*n + z*h
            srow = pl.multiple_of(row0 + grow, b_pad)
            seq_scr[pl.ds(srow, b_pad), :] = h_new.astype(seq_scr.dtype)
            return h_new

        return jax.lax.fori_loop(0, t_block, step, h, unroll=min(t_block, 8))

    h0 = jnp.zeros((b_pad, h_pad), jnp.float32)
    h_last = jax.lax.fori_loop(0, n_blocks, block_body, h0)

    # Linear head fused on the last layer's final hidden state.
    @pl.when(layer == num_layers - 1)
    def _():
        out = (jnp.dot(h_last.astype(cd), w_out_ref[...],
                       preferred_element_type=jnp.float32) + b_out_ref[...])
        out_ref[...] = out.astype(out_ref.dtype)


def _pack_gates_w(w, rows, rows_pad, hidden, h_pad, dtype):
    """(3H, rows) PyTorch layout -> (rows_pad, 3*Hp); one 128-lane block per gate."""
    gates = jnp.split(w, 3, axis=0)
    blocks = [jnp.pad(g.T, ((0, rows_pad - rows), (0, h_pad - hidden))) for g in gates]
    return jnp.concatenate(blocks, axis=1).astype(dtype)


@functools.partial(jax.jit, static_argnames=("hidden_size", "compute_dtype"))
def simple_gru_forward(x_bti, params, hidden_size, compute_dtype=jnp.float32):
    """x_bti: (B, T, input_size) batch-first like the PyTorch module -> (B, output_size)."""
    B, T, I = x_bti.shape
    H = hidden_size
    L = len(params["layers"])
    O = params["w_out"].shape[0]

    Bp = _round_up(B, _SUBLANE)
    # TODO(synk): round Hp to 256 on v6e/v7x when H >= 256 (2x256^2 MXU K-fill).
    Hp = _round_up(H, _LANE)
    Ip = _round_up(I, _LANE)
    Op = _round_up(O, _LANE)
    Mp = max(Ip, Hp)                      # shared row count for stacked W_ih

    cd = compute_dtype
    cd_bytes = jnp.dtype(cd).itemsize

    # time-major, padded, flattened to (T*Bp, Mp), stored in the matmul dtype
    x_tbi = jnp.transpose(x_bti, (1, 0, 2)).astype(jnp.float32)
    x_flat = (jnp.pad(x_tbi, ((0, 0), (0, Bp - B), (0, Mp - I)))
              .reshape(T * Bp, Mp).astype(cd))

    wih_list, whh_list, gib_list, bhn_list = [], [], [], []
    in_dim = I
    for lp in params["layers"]:
        wih_list.append(_pack_gates_w(lp["w_ih"], in_dim, Mp, H, Hp, cd))
        whh_list.append(_pack_gates_w(lp["w_hh"], H, Hp, H, Hp, cd))
        b_ir, b_iz, b_in = jnp.split(lp["b_ih"], 3)
        b_hr, b_hz, b_hn = jnp.split(lp["b_hh"], 3)
        padh = lambda v: jnp.pad(v, (0, Hp - H))
        gib_list.append(jnp.concatenate(
            [padh(b_ir + b_hr), padh(b_iz + b_hz), padh(b_in)]).reshape(1, 3 * Hp))
        bhn_list.append(padh(b_hn).reshape(1, Hp))
        in_dim = H

    wih_stack = jnp.stack(wih_list)                          # (L, Mp, 3*Hp)
    whh_stack = jnp.stack(whh_list)                          # (L, Hp, 3*Hp)
    gib_stack = jnp.stack(gib_list).astype(jnp.float32)      # (L, 1, 3*Hp)
    bhn_stack = jnp.stack(bhn_list).astype(jnp.float32)      # (L, 1, Hp)

    w_out_p = jnp.pad(params["w_out"].T, ((0, Hp - H), (0, Op - O))).astype(cd)
    b_out_p = jnp.pad(params["b_out"], (0, Op - O)).reshape(1, Op).astype(jnp.float32)

    # Time-blocking: hoisted-projection scratch capped at ~2 MiB.
    TB = _largest_divisor_leq(T, max(1, (2 << 20) // (Bp * 3 * Hp * 4)))

    # Explicit VMEM budget sized to the actual working set (+25% headroom).
    layer_w_bytes = (Mp * 3 * Hp + Hp * 3 * Hp) * cd_bytes + (3 * Hp + Hp) * 4
    working_set = (
        2 * T * Bp * Mp * cd_bytes            # x window
        + 2 * layer_w_bytes                   # double-buffered per-layer weights
        + 2 * (Hp * Op * cd_bytes + Op * 4)   # head weights
        + 2 * Bp * Op * 4                     # output
        + TB * Bp * 3 * Hp * 4                # gi scratch
        + T * Bp * Hp * cd_bytes              # inter-layer activations
    )
    vmem_limit = int(min(100 << 20, max(working_set * 5 // 4 + (2 << 20), 16 << 20)))

    flops = (2 * T * Bp * Mp * 3 * Hp
             + 2 * T * Bp * Hp * 3 * Hp * max(L - 1, 0)
             + 2 * T * Bp * Hp * 3 * Hp * L
             + 2 * Bp * Hp * Op)
    cost = pl.CostEstimate(
        flops=int(flops),
        transcendentals=int(3 * T * Bp * Hp * L),
        bytes_accessed=int(x_flat.size * cd_bytes
                           + (wih_stack.size + whh_stack.size) * cd_bytes
                           + (gib_stack.size + bhn_stack.size) * 4
                           + w_out_p.size * cd_bytes + b_out_p.size * 4
                           + Bp * Op * 4))

    kernel = functools.partial(
        _gru_kernel, num_layers=L, seq_len=T, t_block=TB, b_pad=Bp, h_pad=Hp)

    # TODO(synk): for very long sequences, additionally stream x / seq activations
    # from HBM with pltpu.emit_pipeline instead of keeping them VMEM-resident, and
    # add a batch-block "parallel" grid axis to use both v7x TensorCores.
    grid_spec = pltpu.PrefetchScalarGridSpec(
        num_scalar_prefetch=0,
        grid=(L,),
        in_specs=[
            pl.BlockSpec((T * Bp, Mp), lambda l: (0, 0)),          # x (resident)
            pl.BlockSpec((None, Mp, 3 * Hp), lambda l: (l, 0, 0)),  # W_ih[l]
            pl.BlockSpec((None, Hp, 3 * Hp), lambda l: (l, 0, 0)),  # W_hh[l]
            pl.BlockSpec((None, 1, 3 * Hp), lambda l: (l, 0, 0)),   # folded gi bias
            pl.BlockSpec((None, 1, Hp), lambda l: (l, 0, 0)),       # b_hn
            pl.BlockSpec((Hp, Op), lambda l: (0, 0)),               # head W
            pl.BlockSpec((1, Op), lambda l: (0, 0)),                # head b
        ],
        out_specs=pl.BlockSpec((Bp, Op), lambda l: (0, 0)),
        scratch_shapes=[
            pltpu.VMEM((TB * Bp, 3 * Hp), jnp.float32),  # hoisted gates (time block)
            pltpu.VMEM((T * Bp, Hp), cd),                # inter-layer activations
        ],
    )

    out_pad = pl.pallas_call(
        kernel,
        out_shape=jax.ShapeDtypeStruct((Bp, Op), jnp.float32),
        grid_spec=grid_spec,
        compiler_params=pltpu.CompilerParams(
            dimension_semantics=("arbitrary",),
            vmem_limit_bytes=vmem_limit),
        cost_estimate=cost,
    )(x_flat, wih_stack, whh_stack, gib_stack, bhn_stack, w_out_p, b_out_p)
    return out_pad[:B, :O]


def init_params(key, input_size, hidden_size, num_layers, output_size):
    """Deterministic init mimicking PyTorch's U(-1/sqrt(H), 1/sqrt(H))."""
    params = {"layers": []}
    bound = 1.0 / jnp.sqrt(jnp.float32(hidden_size))
    for layer in range(num_layers):
        in_dim = input_size if layer == 0 else hidden_size
        key, k1, k2, k3, k4 = jax.random.split(key, 5)
        params["layers"].append({
            "w_ih": jax.random.uniform(k1, (3 * hidden_size, in_dim), jnp.float32, -bound, bound),
            "w_hh": jax.random.uniform(k2, (3 * hidden_size, hidden_size), jnp.float32, -bound, bound),
            "b_ih": jax.random.uniform(k3, (3 * hidden_size,), jnp.float32, -bound, bound),
            "b_hh": jax.random.uniform(k4, (3 * hidden_size,), jnp.float32, -bound, bound),
        })
    key, k5, k6 = jax.random.split(key, 3)
    params["w_out"] = jax.random.uniform(k5, (output_size, hidden_size), jnp.float32, -bound, bound)
    params["b_out"] = jax.random.uniform(k6, (output_size,), jnp.float32, -bound, bound)
    return params


def _reference_forward(x_bti, params, hidden_size):
    """Pure-JAX reference of the PyTorch forward, for a sanity check."""
    B = x_bti.shape[0]
    seq = jnp.transpose(x_bti, (1, 0, 2))
    for lp in params["layers"]:
        h = jnp.zeros((B, hidden_size), jnp.float32)
        outs = []
        for t in range(seq.shape[0]):
            gi = seq[t] @ lp["w_ih"].T + lp["b_ih"]
            gh = h @ lp["w_hh"].T + lp["b_hh"]
            i_r, i_z, i_n = jnp.split(gi, 3, axis=-1)
            h_r, h_z, h_n = jnp.split(gh, 3, axis=-1)
            r = jax.nn.sigmoid(i_r + h_r)
            z = jax.nn.sigmoid(i_z + h_z)
            n = jnp.tanh(i_n + r * h_n)
            h = (1.0 - z) * n + z * h
            outs.append(h)
        seq = jnp.stack(outs, axis=0)
    return seq[-1] @ params["w_out"].T + params["b_out"]


if __name__ == "__main__":
    batch = 2
    seq_len = 8
    input_size = 16
    hidden_size = 32
    num_layers = 2
    output_size = 8

    key = jax.random.PRNGKey(0)
    key, xk, pk = jax.random.split(key, 3)
    x = jax.random.normal(xk, (batch, seq_len, input_size), jnp.float32)
    params = init_params(pk, input_size, hidden_size, num_layers, output_size)

    # f32 operands: tight match with the pure-JAX / PyTorch math.
    out = jax.block_until_ready(simple_gru_forward(x, params, hidden_size))
    assert out.shape == (batch, output_size)
    ref = _reference_forward(x, params, hidden_size)
    assert jnp.allclose(out, ref, atol=1e-4, rtol=1e-4), "f32 mismatch vs reference"

    # bf16 matmul operands + bf16 activation scratch (f32 accumulation/carry).
    # Note: bf16 h is re-rounded each step, so error grows with T (documented).
    out_bf16 = jax.block_until_ready(
        simple_gru_forward(x, params, hidden_size, compute_dtype=jnp.bfloat16))
    assert jnp.allclose(out_bf16, ref, atol=1e-1, rtol=1e-1), "bf16 mismatch vs reference"

    print("KERNEL_OK")
</pallas_src>

<mosaic_0001>
module attributes {stable_mosaic.version = 11 : i64} {
  func.func @_gru_kernel(%arg0: i32, %arg1: memref<64x128xf32, #tpu.memory_space<vmem>>, %arg2: memref<1x128x384xf32, #tpu.memory_space<vmem>>, %arg3: memref<1x128x384xf32, #tpu.memory_space<vmem>>, %arg4: memref<1x1x384xf32, #tpu.memory_space<vmem>>, %arg5: memref<1x1x128xf32, #tpu.memory_space<vmem>>, %arg6: memref<128x128xf32, #tpu.memory_space<vmem>>, %arg7: memref<1x128xf32, #tpu.memory_space<vmem>>, %arg8: memref<8x128xf32, #tpu.memory_space<vmem>>, %arg9: memref<64x384xf32, #tpu.memory_space<vmem>>, %arg10: memref<64x128xf32, #tpu.memory_space<vmem>>) attributes {dimension_semantics = [#tpu.dimension_semantics<arbitrary>], iteration_bounds = array<i64: 2>, scalar_prefetch = 0 : i64, scratch_operands = 2 : i64, tpu.core_type = #tpu.core_type<tc>, window_params = [{pipeline_mode = #tpu.pipeline_mode<synchronous>, transform_indices = @transform_0, window_bounds = array<i64: 64, 128>}, {transform_indices = @transform_1, window_bounds = array<i64: 1, 128, 384>}, {transform_indices = @transform_2, window_bounds = array<i64: 1, 128, 384>}, {transform_indices = @transform_3, window_bounds = array<i64: 1, 1, 384>}, {transform_indices = @transform_4, window_bounds = array<i64: 1, 1, 128>}, {pipeline_mode = #tpu.pipeline_mode<synchronous>, transform_indices = @transform_5, window_bounds = array<i64: 128, 128>}, {pipeline_mode = #tpu.pipeline_mode<synchronous>, transform_indices = @transform_6, window_bounds = array<i64: 1, 128>}, {pipeline_mode = #tpu.pipeline_mode<synchronous>, transform_indices = @transform_7, window_bounds = array<i64: 8, 128>}]} {
    %c0 = arith.constant 0 : index
    %c0_0 = arith.constant 0 : index
    %c0_1 = arith.constant 0 : index
    %0 = vector.load %arg4[%c0, %c0_0, %c0_1] : memref<1x1x384xf32, #tpu.memory_space<vmem>>, vector<1x1x384xf32>
    %1 = vector.shape_cast %0 : vector<1x1x384xf32> to vector<1x384xf32>
    %c0_2 = arith.constant 0 : index
    %c0_3 = arith.constant 0 : index
    %c0_4 = arith.constant 0 : index
    %2 = vector.load %arg5[%c0_2, %c0_3, %c0_4] : memref<1x1x128xf32, #tpu.memory_space<vmem>>, vector<1x1x128xf32>
    %3 = vector.shape_cast %2 : vector<1x1x128xf32> to vector<1x128xf32>
    %4 = vector.shape_cast %3 : vector<1x128xf32> to vector<1x128xf32>
    %5 = vector.broadcast %4 : vector<1x128xf32> to vector<8x128xf32>
    %cst = arith.constant 0.000000e+00 : f32
    %6 = vector.broadcast %cst : f32 to vector<8x128xf32>
    %c0_i32 = arith.constant 0 : i32
    %c64_i32 = arith.constant 64 : i32
    %7 = arith.muli %c0_i32, %c64_i32 : i32
    %8 = tpu.assume_multiple %7, 64 : i32
    %c0_i32_5 = arith.constant 0 : i32
    %9 = arith.cmpi eq, %arg0, %c0_i32_5 : i32
    %10 = arith.extui %9 : i1 to i32
    %c0_i32_6 = arith.constant 0 : i32
    %11 = arith.cmpi ne, %10, %c0_i32_6 : i32
    scf.if %11 {
      %322 = arith.index_cast %8 : i32 to index
      %c0_116 = arith.constant 0 : index
      %323 = vector.load %arg1[%322, %c0_116] : memref<64x128xf32, #tpu.memory_space<vmem>>, vector<64x128xf32>
      %c0_117 = arith.constant 0 : index
      %c0_118 = arith.constant 0 : index
      %c0_119 = arith.constant 0 : index
      %324 = vector.load %arg2[%c0_117, %c0_118, %c0_119] : memref<1x128x384xf32, #tpu.memory_space<vmem>>, vector<1x128x384xf32>
      %325 = vector.shape_cast %324 : vector<1x128x384xf32> to vector<128x384xf32>
      %cst_120 = arith.constant dense<0.000000e+00> : vector<64x384xf32>
      %326 = tpu.matmul %323, %325, %cst_120 {dimension_numbers = #tpu.dot_dimension_numbers<[1], [0], [0], [1], [0, 0, 1, 1], [], []>} : vector<64x128xf32>, vector<128x384xf32>, vector<64x384xf32> -> vector<64x384xf32>
      %327 = vector.broadcast %1 : vector<1x384xf32> to vector<64x384xf32>
      %328 = arith.addf %326, %327 : vector<64x384xf32>
      %c0_121 = arith.constant 0 : index
      %c0_122 = arith.constant 0 : index
      %329 = vector.load %arg9[%c0_121, %c0_122] : memref<64x384xf32, #tpu.memory_space<vmem>>, vector<64x384xf32>
      tpu.vector_store %arg9[%c0_121, %c0_122], %328 {strides = array<i32>} : memref<64x384xf32, #tpu.memory_space<vmem>>, vector<64x384xf32>,
    } else {
    }
    %c0_i32_7 = arith.constant 0 : i32
    %12 = arith.cmpi sgt, %arg0, %c0_i32_7 : i32
    %13 = arith.extui %12 : i1 to i32
    %c0_i32_8 = arith.constant 0 : i32
    %14 = arith.cmpi ne, %13, %c0_i32_8 : i32
    scf.if %14 {
      %322 = arith.index_cast %8 : i32 to index
      %c0_116 = arith.constant 0 : index
      %323 = vector.load %arg10[%322, %c0_116] : memref<64x128xf32, #tpu.memory_space<vmem>>, vector<64x128xf32>
      %c0_117 = arith.constant 0 : index
      %c0_118 = arith.constant 0 : index
      %c0_119 = arith.constant 0 : index
      %324 = vector.load %arg2[%c0_117, %c0_118, %c0_119] : memref<1x128x384xf32, #tpu.memory_space<vmem>>, vector<1x128x384xf32>
      %325 = vector.shape_cast %324 : vector<1x128x384xf32> to vector<128x384xf32>
      %cst_120 = arith.constant dense<0.000000e+00> : vector<64x384xf32>
      %326 = tpu.matmul %323, %325, %cst_120 {dimension_numbers = #tpu.dot_dimension_numbers<[1], [0], [0], [1], [0, 0, 1, 1], [], []>} : vector<64x128xf32>, vector<128x384xf32>, vector<64x384xf32> -> vector<64x384xf32>
      %327 = vector.broadcast %1 : vector<1x384xf32> to vector<64x384xf32>
      %328 = arith.addf %326, %327 : vector<64x384xf32>
      %c0_121 = arith.constant 0 : index
      %c0_122 = arith.constant 0 : index
      %329 = vector.load %arg9[%c0_121, %c0_122] : memref<64x384xf32, #tpu.memory_space<vmem>>, vector<64x384xf32>
      tpu.vector_store %arg9[%c0_121, %c0_122], %328 {strides = array<i32>} : memref<64x384xf32, #tpu.memory_space<vmem>>, vector<64x384xf32>,
    } else {
    }
    %c0_i32_9 = arith.constant 0 : i32
    %c8_i32 = arith.constant 8 : i32
    %15 = arith.muli %c0_i32_9, %c8_i32 : i32
    %16 = tpu.assume_multiple %15, 8 : i32
    %17 = arith.index_cast %16 : i32 to index
    %c0_10 = arith.constant 0 : index
    %18 = vector.load %arg9[%17, %c0_10] : memref<64x384xf32, #tpu.memory_space<vmem>>, vector<8x384xf32>
    %c0_11 = arith.constant 0 : index
    %c0_12 = arith.constant 0 : index
    %c0_13 = arith.constant 0 : index
    %19 = vector.load %arg3[%c0_11, %c0_12, %c0_13] : memref<1x128x384xf32, #tpu.memory_space<vmem>>, vector<1x128x256xf32>
    %20 = vector.shape_cast %19 : vector<1x128x256xf32> to vector<128x256xf32>
    %cst_14 = arith.constant dense<0.000000e+00> : vector<8x256xf32>
    %21 = tpu.matmul %6, %20, %cst_14 {dimension_numbers = #tpu.dot_dimension_numbers<[1], [0], [0], [1], [0, 0, 1, 1], [], []>} : vector<8x128xf32>, vector<128x256xf32>, vector<8x256xf32> -> vector<8x256xf32>
    %22 = vector.extract_strided_slice %18 {offsets = [0, 0], sizes = [8, 128], strides = [1, 1]} : vector<8x384xf32> to vector<8x128xf32>
    %23 = vector.extract_strided_slice %21 {offsets = [0, 0], sizes = [8, 128], strides = [1, 1]} : vector<8x256xf32> to vector<8x128xf32>
    %24 = arith.addf %22, %23 : vector<8x128xf32>
    %25 = arith.negf %24 : vector<8x128xf32>
    %26 = math.exp %25 : vector<8x128xf32>
    %cst_15 = arith.constant 1.000000e+00 : f32
    %27 = vector.broadcast %cst_15 : f32 to vector<8x128xf32>
    %28 = arith.addf %27, %26 : vector<8x128xf32>
    %29 = arith.divf %27, %28 : vector<8x128xf32>
    %30 = vector.extract_strided_slice %18 {offsets = [0, 128], sizes = [8, 128], strides = [1, 1]} : vector<8x384xf32> to vector<8x128xf32>
    %31 = vector.extract_strided_slice %21 {offsets = [0, 128], sizes = [8, 128], strides = [1, 1]} : vector<8x256xf32> to vector<8x128xf32>
    %32 = arith.addf %30, %31 : vector<8x128xf32>
    %33 = arith.negf %32 : vector<8x128xf32>
    %34 = math.exp %33 : vector<8x128xf32>
    %cst_16 = arith.constant 1.000000e+00 : f32
    %35 = vector.broadcast %cst_16 : f32 to vector<8x128xf32>
    %36 = arith.addf %35, %34 : vector<8x128xf32>
    %37 = arith.divf %35, %36 : vector<8x128xf32>
    %c0_17 = arith.constant 0 : index
    %c0_18 = arith.constant 0 : index
    %c256 = arith.constant 256 : index
    %38 = vector.load %arg3[%c0_17, %c0_18, %c256] : memref<1x128x384xf32, #tpu.memory_space<vmem>>, vector<1x128x128xf32>
    %39 = vector.shape_cast %38 : vector<1x128x128xf32> to vector<128x128xf32>
    %cst_19 = arith.constant dense<0.000000e+00> : vector<8x128xf32>
    %40 = tpu.matmul %6, %39, %cst_19 {dimension_numbers = #tpu.dot_dimension_numbers<[1], [0], [0], [1], [0, 0, 1, 1], [], []>} : vector<8x128xf32>, vector<128x128xf32>, vector<8x128xf32> -> vector<8x128xf32>
    %41 = arith.addf %40, %5 : vector<8x128xf32>
    %42 = vector.extract_strided_slice %18 {offsets = [0, 256], sizes = [8, 128], strides = [1, 1]} : vector<8x384xf32> to vector<8x128xf32>
    %43 = arith.mulf %29, %41 : vector<8x128xf32>
    %44 = arith.addf %42, %43 : vector<8x128xf32>
    %45 = math.tanh %44 : vector<8x128xf32>
    %46 = arith.subf %6, %45 : vector<8x128xf32>
    %47 = arith.mulf %37, %46 : vector<8x128xf32>
    %48 = arith.addf %45, %47 : vector<8x128xf32>
    %49 = arith.addi %8, %16 : i32
    %50 = tpu.assume_multiple %49, 8 : i32
    %51 = arith.index_cast %50 : i32 to index
    %c0_20 = arith.constant 0 : index
    %52 = vector.load %arg10[%51, %c0_20] : memref<64x128xf32, #tpu.memory_space<vmem>>, vector<8x128xf32>
    tpu.vector_store %arg10[%51, %c0_20], %48 {strides = array<i32>} : memref<64x128xf32, #tpu.memory_space<vmem>>, vector<8x128xf32>,
    %c1_i32 = arith.constant 1 : i32
    %c8_i32_21 = arith.constant 8 : i32
    %53 = arith.muli %c1_i32, %c8_i32_21 : i32
    %54 = tpu.assume_multiple %53, 8 : i32
    %55 = arith.index_cast %54 : i32 to index
    %c0_22 = arith.constant 0 : index
    %56 = vector.load %arg9[%55, %c0_22] : memref<64x384xf32, #tpu.memory_space<vmem>>, vector<8x384xf32>
    %c0_23 = arith.constant 0 : index
    %c0_24 = arith.constant 0 : index
    %c0_25 = arith.constant 0 : index
    %57 = vector.load %arg3[%c0_23, %c0_24, %c0_25] : memref<1x128x384xf32, #tpu.memory_space<vmem>>, vector<1x128x256xf32>
    %58 = vector.shape_cast %57 : vector<1x128x256xf32> to vector<128x256xf32>
    %cst_26 = arith.constant dense<0.000000e+00> : vector<8x256xf32>
    %59 = tpu.matmul %48, %58, %cst_26 {dimension_numbers = #tpu.dot_dimension_numbers<[1], [0], [0], [1], [0, 0, 1, 1], [], []>} : vector<8x128xf32>, vector<128x256xf32>, vector<8x256xf32> -> vector<8x256xf32>
    %60 = vector.extract_strided_slice %56 {offsets = [0, 0], sizes = [8, 128], strides = [1, 1]} : vector<8x384xf32> to vector<8x128xf32>
    %61 = vector.extract_strided_slice %59 {offsets = [0, 0], sizes = [8, 128], strides = [1, 1]} : vector<8x256xf32> to vector<8x128xf32>
    %62 = arith.addf %60, %61 : vector<8x128xf32>
    %63 = arith.negf %62 : vector<8x128xf32>
    %64 = math.exp %63 : vector<8x128xf32>
    %cst_27 = arith.constant 1.000000e+00 : f32
    %65 = vector.broadcast %cst_27 : f32 to vector<8x128xf32>
    %66 = arith.addf %65, %64 : vector<8x128xf32>
    %67 = arith.divf %65, %66 : vector<8x128xf32>
    %68 = vector.extract_strided_slice %56 {offsets = [0, 128], sizes = [8, 128], strides = [1, 1]} : vector<8x384xf32> to vector<8x128xf32>
    %69 = vector.extract_strided_slice %59 {offsets = [0, 128], sizes = [8, 128], strides = [1, 1]} : vector<8x256xf32> to vector<8x128xf32>
    %70 = arith.addf %68, %69 : vector<8x128xf32>
    %71 = arith.negf %70 : vector<8x128xf32>
    %72 = math.exp %71 : vector<8x128xf32>
    %cst_28 = arith.constant 1.000000e+00 : f32
    %73 = vector.broadcast %cst_28 : f32 to vector<8x128xf32>
    %74 = arith.addf %73, %72 : vector<8x128xf32>
    %75 = arith.divf %73, %74 : vector<8x128xf32>
    %c0_29 = arith.constant 0 : index
    %c0_30 = arith.constant 0 : index
    %c256_31 = arith.constant 256 : index
    %76 = vector.load %arg3[%c0_29, %c0_30, %c256_31] : memref<1x128x384xf32, #tpu.memory_space<vmem>>, vector<1x128x128xf32>
    %77 = vector.shape_cast %76 : vector<1x128x128xf32> to vector<128x128xf32>
    %cst_32 = arith.constant dense<0.000000e+00> : vector<8x128xf32>
    %78 = tpu.matmul %48, %77, %cst_32 {dimension_numbers = #tpu.dot_dimension_numbers<[1], [0], [0], [1], [0, 0, 1, 1], [], []>} : vector<8x128xf32>, vector<128x128xf32>, vector<8x128xf32> -> vector<8x128xf32>
    %79 = arith.addf %78, %5 : vector<8x128xf32>
    %80 = vector.extract_strided_slice %56 {offsets = [0, 256], sizes = [8, 128], strides = [1, 1]} : vector<8x384xf32> to vector<8x128xf32>
    %81 = arith.mulf %67, %79 : vector<8x128xf32>
    %82 = arith.addf %80, %81 : vector<8x128xf32>
    %83 = math.tanh %82 : vector<8x128xf32>
    %84 = arith.subf %48, %83 : vector<8x128xf32>
    %85 = arith.mulf %75, %84 : vector<8x128xf32>
    %86 = arith.addf %83, %85 : vector<8x128xf32>
    %87 = arith.addi %8, %54 : i32
    %88 = tpu.assume_multiple %87, 8 : i32
    %89 = arith.index_cast %88 : i32 to index
    %c0_33 = arith.constant 0 : index
    %90 = vector.load %arg10[%89, %c0_33] : memref<64x128xf32, #tpu.memory_space<vmem>>, vector<8x128xf32>
    tpu.vector_store %arg10[%89, %c0_33], %86 {strides = array<i32>} : memref<64x128xf32, #tpu.memory_space<vmem>>, vector<8x128xf32>,
    %c2_i32 = arith.constant 2 : i32
    %c8_i32_34 = arith.constant 8 : i32
    %91 = arith.muli %c2_i32, %c8_i32_34 : i32
    %92 = tpu.assume_multiple %91, 8 : i32
    %93 = arith.index_cast %92 : i32 to index
    %c0_35 = arith.constant 0 : index
    %94 = vector.load %arg9[%93, %c0_35] : memref<64x384xf32, #tpu.memory_space<vmem>>, vector<8x384xf32>
    %c0_36 = arith.constant 0 : index
    %c0_37 = arith.constant 0 : index
    %c0_38 = arith.constant 0 : index
    %95 = vector.load %arg3[%c0_36, %c0_37, %c0_38] : memref<1x128x384xf32, #tpu.memory_space<vmem>>, vector<1x128x256xf32>
    %96 = vector.shape_cast %95 : vector<1x128x256xf32> to vector<128x256xf32>
    %cst_39 = arith.constant dense<0.000000e+00> : vector<8x256xf32>
    %97 = tpu.matmul %86, %96, %cst_39 {dimension_numbers = #tpu.dot_dimension_numbers<[1], [0], [0], [1], [0, 0, 1, 1], [], []>} : vector<8x128xf32>, vector<128x256xf32>, vector<8x256xf32> -> vector<8x256xf32>
    %98 = vector.extract_strided_slice %94 {offsets = [0, 0], sizes = [8, 128], strides = [1, 1]} : vector<8x384xf32> to vector<8x128xf32>
    %99 = vector.extract_strided_slice %97 {offsets = [0, 0], sizes = [8, 128], strides = [1, 1]} : vector<8x256xf32> to vector<8x128xf32>
    %100 = arith.addf %98, %99 : vector<8x128xf32>
    %101 = arith.negf %100 : vector<8x128xf32>
    %102 = math.exp %101 : vector<8x128xf32>
    %cst_40 = arith.constant 1.000000e+00 : f32
    %103 = vector.broadcast %cst_40 : f32 to vector<8x128xf32>
    %104 = arith.addf %103, %102 : vector<8x128xf32>
    %105 = arith.divf %103, %104 : vector<8x128xf32>
    %106 = vector.extract_strided_slice %94 {offsets = [0, 128], sizes = [8, 128], strides = [1, 1]} : vector<8x384xf32> to vector<8x128xf32>
    %107 = vector.extract_strided_slice %97 {offsets = [0, 128], sizes = [8, 128], strides = [1, 1]} : vector<8x256xf32> to vector<8x128xf32>
    %108 = arith.addf %106, %107 : vector<8x128xf32>
    %109 = arith.negf %108 : vector<8x128xf32>
    %110 = math.exp %109 : vector<8x128xf32>
    %cst_41 = arith.constant 1.000000e+00 : f32
    %111 = vector.broadcast %cst_41 : f32 to vector<8x128xf32>
    %112 = arith.addf %111, %110 : vector<8x128xf32>
    %113 = arith.divf %111, %112 : vector<8x128xf32>
    %c0_42 = arith.constant 0 : index
    %c0_43 = arith.constant 0 : index
    %c256_44 = arith.constant 256 : index
    %114 = vector.load %arg3[%c0_42, %c0_43, %c256_44] : memref<1x128x384xf32, #tpu.memory_space<vmem>>, vector<1x128x128xf32>
    %115 = vector.shape_cast %114 : vector<1x128x128xf32> to vector<128x128xf32>
    %cst_45 = arith.constant dense<0.000000e+00> : vector<8x128xf32>
    %116 = tpu.matmul %86, %115, %cst_45 {dimension_numbers = #tpu.dot_dimension_numbers<[1], [0], [0], [1], [0, 0, 1, 1], [], []>} : vector<8x128xf32>, vector<128x128xf32>, vector<8x128xf32> -> vector<8x128xf32>
    %117 = arith.addf %116, %5 : vector<8x128xf32>
    %118 = vector.extract_strided_slice %94 {offsets = [0, 256], sizes = [8, 128], strides = [1, 1]} : vector<8x384xf32> to vector<8x128xf32>
    %119 = arith.mulf %105, %117 : vector<8x128xf32>
    %120 = arith.addf %118, %119 : vector<8x128xf32>
    %121 = math.tanh %120 : vector<8x128xf32>
    %122 = arith.subf %86, %121 : vector<8x128xf32>
    %123 = arith.mulf %113, %122 : vector<8x128xf32>
    %124 = arith.addf %121, %123 : vector<8x128xf32>
    %125 = arith.addi %8, %92 : i32
    %126 = tpu.assume_multiple %125, 8 : i32
    %127 = arith.index_cast %126 : i32 to index
    %c0_46 = arith.constant 0 : index
    %128 = vector.load %arg10[%127, %c0_46] : memref<64x128xf32, #tpu.memory_space<vmem>>, vector<8x128xf32>
    tpu.vector_store %arg10[%127, %c0_46], %124 {strides = array<i32>} : memref<64x128xf32, #tpu.memory_space<vmem>>, vector<8x128xf32>,
    %c3_i32 = arith.constant 3 : i32
    %c8_i32_47 = arith.constant 8 : i32
    %129 = arith.muli %c3_i32, %c8_i32_47 : i32
    %130 = tpu.assume_multiple %129, 8 : i32
    %131 = arith.index_cast %130 : i32 to index
    %c0_48 = arith.constant 0 : index
    %132 = vector.load %arg9[%131, %c0_48] : memref<64x384xf32, #tpu.memory_space<vmem>>, vector<8x384xf32>
    %c0_49 = arith.constant 0 : index
    %c0_50 = arith.constant 0 : index
    %c0_51 = arith.constant 0 : index
    %133 = vector.load %arg3[%c0_49, %c0_50, %c0_51] : memref<1x128x384xf32, #tpu.memory_space<vmem>>, vector<1x128x256xf32>
    %134 = vector.shape_cast %133 : vector<1x128x256xf32> to vector<128x256xf32>
    %cst_52 = arith.constant dense<0.000000e+00> : vector<8x256xf32>
    %135 = tpu.matmul %124, %134, %cst_52 {dimension_numbers = #tpu.dot_dimension_numbers<[1], [0], [0], [1], [0, 0, 1, 1], [], []>} : vector<8x128xf32>, vector<128x256xf32>, vector<8x256xf32> -> vector<8x256xf32>
    %136 = vector.extract_strided_slice %132 {offsets = [0, 0], sizes = [8, 128], strides = [1, 1]} : vector<8x384xf32> to vector<8x128xf32>
    %137 = vector.extract_strided_slice %135 {offsets = [0, 0], sizes = [8, 128], strides = [1, 1]} : vector<8x256xf32> to vector<8x128xf32>
    %138 = arith.addf %136, %137 : vector<8x128xf32>
    %139 = arith.negf %138 : vector<8x128xf32>
    %140 = math.exp %139 : vector<8x128xf32>
    %cst_53 = arith.constant 1.000000e+00 : f32
    %141 = vector.broadcast %cst_53 : f32 to vector<8x128xf32>
    %142 = arith.addf %141, %140 : vector<8x128xf32>
    %143 = arith.divf %141, %142 : vector<8x128xf32>
    %144 = vector.extract_strided_slice %132 {offsets = [0, 128], sizes = [8, 128], strides = [1, 1]} : vector<8x384xf32> to vector<8x128xf32>
    %145 = vector.extract_strided_slice %135 {offsets = [0, 128], sizes = [8, 128], strides = [1, 1]} : vector<8x256xf32> to vector<8x128xf32>
    %146 = arith.addf %144, %145 : vector<8x128xf32>
    %147 = arith.negf %146 : vector<8x128xf32>
    %148 = math.exp %147 : vector<8x128xf32>
    %cst_54 = arith.constant 1.000000e+00 : f32
    %149 = vector.broadcast %cst_54 : f32 to vector<8x128xf32>
    %150 = arith.addf %149, %148 : vector<8x128xf32>
    %151 = arith.divf %149, %150 : vector<8x128xf32>
    %c0_55 = arith.constant 0 : index
    %c0_56 = arith.constant 0 : index
    %c256_57 = arith.constant 256 : index
    %152 = vector.load %arg3[%c0_55, %c0_56, %c256_57] : memref<1x128x384xf32, #tpu.memory_space<vmem>>, vector<1x128x128xf32>
    %153 = vector.shape_cast %152 : vector<1x128x128xf32> to vector<128x128xf32>
    %cst_58 = arith.constant dense<0.000000e+00> : vector<8x128xf32>
    %154 = tpu.matmul %124, %153, %cst_58 {dimension_numbers = #tpu.dot_dimension_numbers<[1], [0], [0], [1], [0, 0, 1, 1], [], []>} : vector<8x128xf32>, vector<128x128xf32>, vector<8x128xf32> -> vector<8x128xf32>
    %155 = arith.addf %154, %5 : vector<8x128xf32>
    %156 = vector.extract_strided_slice %132 {offsets = [0, 256], sizes = [8, 128], strides = [1, 1]} : vector<8x384xf32> to vector<8x128xf32>
    %157 = arith.mulf %143, %155 : vector<8x128xf32>
    %158 = arith.addf %156, %157 : vector<8x128xf32>
    %159 = math.tanh %158 : vector<8x128xf32>
    %160 = arith.subf %124, %159 : vector<8x128xf32>
    %161 = arith.mulf %151, %160 : vector<8x128xf32>
    %162 = arith.addf %159, %161 : vector<8x128xf32>
    %163 = arith.addi %8, %130 : i32
    %164 = tpu.assume_multiple %163, 8 : i32
    %165 = arith.index_cast %164 : i32 to index
    %c0_59 = arith.constant 0 : index
    %166 = vector.load %arg10[%165, %c0_59] : memref<64x128xf32, #tpu.memory_space<vmem>>, vector<8x128xf32>
    tpu.vector_store %arg10[%165, %c0_59], %162 {strides = array<i32>} : memref<64x128xf32, #tpu.memory_space<vmem>>, vector<8x128xf32>,
    %c4_i32 = arith.constant 4 : i32
    %c8_i32_60 = arith.constant 8 : i32
    %167 = arith.muli %c4_i32, %c8_i32_60 : i32
    %168 = tpu.assume_multiple %167, 8 : i32
    %169 = arith.index_cast %168 : i32 to index
    %c0_61 = arith.constant 0 : index
    %170 = vector.load %arg9[%169, %c0_61] : memref<64x384xf32, #tpu.memory_space<vmem>>, vector<8x384xf32>
    %c0_62 = arith.constant 0 : index
    %c0_63 = arith.constant 0 : index
    %c0_64 = arith.constant 0 : index
    %171 = vector.load %arg3[%c0_62, %c0_63, %c0_64] : memref<1x128x384xf32, #tpu.memory_space<vmem>>, vector<1x128x256xf32>
    %172 = vector.shape_cast %171 : vector<1x128x256xf32> to vector<128x256xf32>
    %cst_65 = arith.constant dense<0.000000e+00> : vector<8x256xf32>
    %173 = tpu.matmul %162, %172, %cst_65 {dimension_numbers = #tpu.dot_dimension_numbers<[1], [0], [0], [1], [0, 0, 1, 1], [], []>} : vector<8x128xf32>, vector<128x256xf32>, vector<8x256xf32> -> vector<8x256xf32>
    %174 = vector.extract_strided_slice %170 {offsets = [0, 0], sizes = [8, 128], strides = [1, 1]} : vector<8x384xf32> to vector<8x128xf32>
    %175 = vector.extract_strided_slice %173 {offsets = [0, 0], sizes = [8, 128], strides = [1, 1]} : vector<8x256xf32> to vector<8x128xf32>
    %176 = arith.addf %174, %175 : vector<8x128xf32>
    %177 = arith.negf %176 : vector<8x128xf32>
    %178 = math.exp %177 : vector<8x128xf32>
    %cst_66 = arith.constant 1.000000e+00 : f32
    %179 = vector.broadcast %cst_66 : f32 to vector<8x128xf32>
    %180 = arith.addf %179, %178 : vector<8x128xf32>
    %181 = arith.divf %179, %180 : vector<8x128xf32>
    %182 = vector.extract_strided_slice %170 {offsets = [0, 128], sizes = [8, 128], strides = [1, 1]} : vector<8x384xf32> to vector<8x128xf32>
    %183 = vector.extract_strided_slice %173 {offsets = [0, 128], sizes = [8, 128], strides = [1, 1]} : vector<8x256xf32> to vector<8x128xf32>
    %184 = arith.addf %182, %183 : vector<8x128xf32>
    %185 = arith.negf %184 : vector<8x128xf32>
    %186 = math.exp %185 : vector<8x128xf32>
    %cst_67 = arith.constant 1.000000e+00 : f32
    %187 = vector.broadcast %cst_67 : f32 to vector<8x128xf32>
    %188 = arith.addf %187, %186 : vector<8x128xf32>
    %189 = arith.divf %187, %188 : vector<8x128xf32>
    %c0_68 = arith.constant 0 : index
    %c0_69 = arith.constant 0 : index
    %c256_70 = arith.constant 256 : index
    %190 = vector.load %arg3[%c0_68, %c0_69, %c256_70] : memref<1x128x384xf32, #tpu.memory_space<vmem>>, vector<1x128x128xf32>
    %191 = vector.shape_cast %190 : vector<1x128x128xf32> to vector<128x128xf32>
    %cst_71 = arith.constant dense<0.000000e+00> : vector<8x128xf32>
    %192 = tpu.matmul %162, %191, %cst_71 {dimension_numbers = #tpu.dot_dimension_numbers<[1], [0], [0], [1], [0, 0, 1, 1], [], []>} : vector<8x128xf32>, vector<128x128xf32>, vector<8x128xf32> -> vector<8x128xf32>
    %193 = arith.addf %192, %5 : vector<8x128xf32>
    %194 = vector.extract_strided_slice %170 {offsets = [0, 256], sizes = [8, 128], strides = [1, 1]} : vector<8x384xf32> to vector<8x128xf32>
    %195 = arith.mulf %181, %193 : vector<8x128xf32>
    %196 = arith.addf %194, %195 : vector<8x128xf32>
    %197 = math.tanh %196 : vector<8x128xf32>
    %198 = arith.subf %162, %197 : vector<8x128xf32>
    %199 = arith.mulf %189, %198 : vector<8x128xf32>
    %200 = arith.addf %197, %199 : vector<8x128xf32>
    %201 = arith.addi %8, %168 : i32
    %202 = tpu.assume_multiple %201, 8 : i32
    %203 = arith.index_cast %202 : i32 to index
    %c0_72 = arith.constant 0 : index
    %204 = vector.load %arg10[%203, %c0_72] : memref<64x128xf32, #tpu.memory_space<vmem>>, vector<8x128xf32>
    tpu.vector_store %arg10[%203, %c0_72], %200 {strides = array<i32>} : memref<64x128xf32, #tpu.memory_space<vmem>>, vector<8x128xf32>,
    %c5_i32 = arith.constant 5 : i32
    %c8_i32_73 = arith.constant 8 : i32
    %205 = arith.muli %c5_i32, %c8_i32_73 : i32
    %206 = tpu.assume_multiple %205, 8 : i32
    %207 = arith.index_cast %206 : i32 to index
    %c0_74 = arith.constant 0 : index
    %208 = vector.load %arg9[%207, %c0_74] : memref<64x384xf32, #tpu.memory_space<vmem>>, vector<8x384xf32>
    %c0_75 = arith.constant 0 : index
    %c0_76 = arith.constant 0 : index
    %c0_77 = arith.constant 0 : index
    %209 = vector.load %arg3[%c0_75, %c0_76, %c0_77] : memref<1x128x384xf32, #tpu.memory_space<vmem>>, vector<1x128x256xf32>
    %210 = vector.shape_cast %209 : vector<1x128x256xf32> to vector<128x256xf32>
    %cst_78 = arith.constant dense<0.000000e+00> : vector<8x256xf32>
    %211 = tpu.matmul %200, %210, %cst_78 {dimension_numbers = #tpu.dot_dimension_numbers<[1], [0], [0], [1], [0, 0, 1, 1], [], []>} : vector<8x128xf32>, vector<128x256xf32>, vector<8x256xf32> -> vector<8x256xf32>
    %212 = vector.extract_strided_slice %208 {offsets = [0, 0], sizes = [8, 128], strides = [1, 1]} : vector<8x384xf32> to vector<8x128xf32>
    %213 = vector.extract_strided_slice %211 {offsets = [0, 0], sizes = [8, 128], strides = [1, 1]} : vector<8x256xf32> to vector<8x128xf32>
    %214 = arith.addf %212, %213 : vector<8x128xf32>
    %215 = arith.negf %214 : vector<8x128xf32>
    %216 = math.exp %215 : vector<8x128xf32>
    %cst_79 = arith.constant 1.000000e+00 : f32
    %217 = vector.broadcast %cst_79 : f32 to vector<8x128xf32>
    %218 = arith.addf %217, %216 : vector<8x128xf32>
    %219 = arith.divf %217, %218 : vector<8x128xf32>
    %220 = vector.extract_strided_slice %208 {offsets = [0, 128], sizes = [8, 128], strides = [1, 1]} : vector<8x384xf32> to vector<8x128xf32>
    %221 = vector.extract_strided_slice %211 {offsets = [0, 128], sizes = [8, 128], strides = [1, 1]} : vector<8x256xf32> to vector<8x128xf32>
    %222 = arith.addf %220, %221 : vector<8x128xf32>
    %223 = arith.negf %222 : vector<8x128xf32>
    %224 = math.exp %223 : vector<8x128xf32>
    %cst_80 = arith.constant 1.000000e+00 : f32
    %225 = vector.broadcast %cst_80 : f32 to vector<8x128xf32>
    %226 = arith.addf %225, %224 : vector<8x128xf32>
    %227 = arith.divf %225, %226 : vector<8x128xf32>
    %c0_81 = arith.constant 0 : index
    %c0_82 = arith.constant 0 : index
    %c256_83 = arith.constant 256 : index
    %228 = vector.load %arg3[%c0_81, %c0_82, %c256_83] : memref<1x128x384xf32, #tpu.memory_space<vmem>>, vector<1x128x128xf32>
    %229 = vector.shape_cast %228 : vector<1x128x128xf32> to vector<128x128xf32>
    %cst_84 = arith.constant dense<0.000000e+00> : vector<8x128xf32>
    %230 = tpu.matmul %200, %229, %cst_84 {dimension_numbers = #tpu.dot_dimension_numbers<[1], [0], [0], [1], [0, 0, 1, 1], [], []>} : vector<8x128xf32>, vector<128x128xf32>, vector<8x128xf32> -> vector<8x128xf32>
    %231 = arith.addf %230, %5 : vector<8x128xf32>
    %232 = vector.extract_strided_slice %208 {offsets = [0, 256], sizes = [8, 128], strides = [1, 1]} : vector<8x384xf32> to vector<8x128xf32>
    %233 = arith.mulf %219, %231 : vector<8x128xf32>
    %234 = arith.addf %232, %233 : vector<8x128xf32>
    %235 = math.tanh %234 : vector<8x128xf32>
    %236 = arith.subf %200, %235 : vector<8x128xf32>
    %237 = arith.mulf %227, %236 : vector<8x128xf32>
    %238 = arith.addf %235, %237 : vector<8x128xf32>
    %239 = arith.addi %8, %206 : i32
    %240 = tpu.assume_multiple %239, 8 : i32
    %241 = arith.index_cast %240 : i32 to index
    %c0_85 = arith.constant 0 : index
    %242 = vector.load %arg10[%241, %c0_85] : memref<64x128xf32, #tpu.memory_space<vmem>>, vector<8x128xf32>
    tpu.vector_store %arg10[%241, %c0_85], %238 {strides = array<i32>} : memref<64x128xf32, #tpu.memory_space<vmem>>, vector<8x128xf32>,
    %c6_i32 = arith.constant 6 : i32
    %c8_i32_86 = arith.constant 8 : i32
    %243 = arith.muli %c6_i32, %c8_i32_86 : i32
    %244 = tpu.assume_multiple %243, 8 : i32
    %245 = arith.index_cast %244 : i32 to index
    %c0_87 = arith.constant 0 : index
    %246 = vector.load %arg9[%245, %c0_87] : memref<64x384xf32, #tpu.memory_space<vmem>>, vector<8x384xf32>
    %c0_88 = arith.constant 0 : index
    %c0_89 = arith.constant 0 : index
    %c0_90 = arith.constant 0 : index
    %247 = vector.load %arg3[%c0_88, %c0_89, %c0_90] : memref<1x128x384xf32, #tpu.memory_space<vmem>>, vector<1x128x256xf32>
    %248 = vector.shape_cast %247 : vector<1x128x256xf32> to vector<128x256xf32>
    %cst_91 = arith.constant dense<0.000000e+00> : vector<8x256xf32>
    %249 = tpu.matmul %238, %248, %cst_91 {dimension_numbers = #tpu.dot_dimension_numbers<[1], [0], [0], [1], [0, 0, 1, 1], [], []>} : vector<8x128xf32>, vector<128x256xf32>, vector<8x256xf32> -> vector<8x256xf32>
    %250 = vector.extract_strided_slice %246 {offsets = [0, 0], sizes = [8, 128], strides = [1, 1]} : vector<8x384xf32> to vector<8x128xf32>
    %251 = vector.extract_strided_slice %249 {offsets = [0, 0], sizes = [8, 128], strides = [1, 1]} : vector<8x256xf32> to vector<8x128xf32>
    %252 = arith.addf %250, %251 : vector<8x128xf32>
    %253 = arith.negf %252 : vector<8x128xf32>
    %254 = math.exp %253 : vector<8x128xf32>
    %cst_92 = arith.constant 1.000000e+00 : f32
    %255 = vector.broadcast %cst_92 : f32 to vector<8x128xf32>
    %256 = arith.addf %255, %254 : vector<8x128xf32>
    %257 = arith.divf %255, %256 : vector<8x128xf32>
    %258 = vector.extract_strided_slice %246 {offsets = [0, 128], sizes = [8, 128], strides = [1, 1]} : vector<8x384xf32> to vector<8x128xf32>
    %259 = vector.extract_strided_slice %249 {offsets = [0, 128], sizes = [8, 128], strides = [1, 1]} : vector<8x256xf32> to vector<8x128xf32>
    %260 = arith.addf %258, %259 : vector<8x128xf32>
    %261 = arith.negf %260 : vector<8x128xf32>
    %262 = math.exp %261 : vector<8x128xf32>
    %cst_93 = arith.constant 1.000000e+00 : f32
    %263 = vector.broadcast %cst_93 : f32 to vector<8x128xf32>
    %264 = arith.addf %263, %262 : vector<8x128xf32>
    %265 = arith.divf %263, %264 : vector<8x128xf32>
    %c0_94 = arith.constant 0 : index
    %c0_95 = arith.constant 0 : index
    %c256_96 = arith.constant 256 : index
    %266 = vector.load %arg3[%c0_94, %c0_95, %c256_96] : memref<1x128x384xf32, #tpu.memory_space<vmem>>, vector<1x128x128xf32>
    %267 = vector.shape_cast %266 : vector<1x128x128xf32> to vector<128x128xf32>
    %cst_97 = arith.constant dense<0.000000e+00> : vector<8x128xf32>
    %268 = tpu.matmul %238, %267, %cst_97 {dimension_numbers = #tpu.dot_dimension_numbers<[1], [0], [0], [1], [0, 0, 1, 1], [], []>} : vector<8x128xf32>, vector<128x128xf32>, vector<8x128xf32> -> vector<8x128xf32>
    %269 = arith.addf %268, %5 : vector<8x128xf32>
    %270 = vector.extract_strided_slice %246 {offsets = [0, 256], sizes = [8, 128], strides = [1, 1]} : vector<8x384xf32> to vector<8x128xf32>
    %271 = arith.mulf %257, %269 : vector<8x128xf32>
    %272 = arith.addf %270, %271 : vector<8x128xf32>
    %273 = math.tanh %272 : vector<8x128xf32>
    %274 = arith.subf %238, %273 : vector<8x128xf32>
    %275 = arith.mulf %265, %274 : vector<8x128xf32>
    %276 = arith.addf %273, %275 : vector<8x128xf32>
    %277 = arith.addi %8, %244 : i32
    %278 = tpu.assume_multiple %277, 8 : i32
    %279 = arith.index_cast %278 : i32 to index
    %c0_98 = arith.constant 0 : index
    %280 = vector.load %arg10[%279, %c0_98] : memref<64x128xf32, #tpu.memory_space<vmem>>, vector<8x128xf32>
    tpu.vector_store %arg10[%279, %c0_98], %276 {strides = array<i32>} : memref<64x128xf32, #tpu.memory_space<vmem>>, vector<8x128xf32>,
    %c7_i32 = arith.constant 7 : i32
    %c8_i32_99 = arith.constant 8 : i32
    %281 = arith.muli %c7_i32, %c8_i32_99 : i32
    %282 = tpu.assume_multiple %281, 8 : i32
    %283 = arith.index_cast %282 : i32 to index
    %c0_100 = arith.constant 0 : index
    %284 = vector.load %arg9[%283, %c0_100] : memref<64x384xf32, #tpu.memory_space<vmem>>, vector<8x384xf32>
    %c0_101 = arith.constant 0 : index
    %c0_102 = arith.constant 0 : index
    %c0_103 = arith.constant 0 : index
    %285 = vector.load %arg3[%c0_101, %c0_102, %c0_103] : memref<1x128x384xf32, #tpu.memory_space<vmem>>, vector<1x128x256xf32>
    %286 = vector.shape_cast %285 : vector<1x128x256xf32> to vector<128x256xf32>
    %cst_104 = arith.constant dense<0.000000e+00> : vector<8x256xf32>
    %287 = tpu.matmul %276, %286, %cst_104 {dimension_numbers = #tpu.dot_dimension_numbers<[1], [0], [0], [1], [0, 0, 1, 1], [], []>} : vector<8x128xf32>, vector<128x256xf32>, vector<8x256xf32> -> vector<8x256xf32>
    %288 = vector.extract_strided_slice %284 {offsets = [0, 0], sizes = [8, 128], strides = [1, 1]} : vector<8x384xf32> to vector<8x128xf32>
    %289 = vector.extract_strided_slice %287 {offsets = [0, 0], sizes = [8, 128], strides = [1, 1]} : vector<8x256xf32> to vector<8x128xf32>
    %290 = arith.addf %288, %289 : vector<8x128xf32>
    %291 = arith.negf %290 : vector<8x128xf32>
    %292 = math.exp %291 : vector<8x128xf32>
    %cst_105 = arith.constant 1.000000e+00 : f32
    %293 = vector.broadcast %cst_105 : f32 to vector<8x128xf32>
    %294 = arith.addf %293, %292 : vector<8x128xf32>
    %295 = arith.divf %293, %294 : vector<8x128xf32>
    %296 = vector.extract_strided_slice %284 {offsets = [0, 128], sizes = [8, 128], strides = [1, 1]} : vector<8x384xf32> to vector<8x128xf32>
    %297 = vector.extract_strided_slice %287 {offsets = [0, 128], sizes = [8, 128], strides = [1, 1]} : vector<8x256xf32> to vector<8x128xf32>
    %298 = arith.addf %296, %297 : vector<8x128xf32>
    %299 = arith.negf %298 : vector<8x128xf32>
    %300 = math.exp %299 : vector<8x128xf32>
    %cst_106 = arith.constant 1.000000e+00 : f32
    %301 = vector.broadcast %cst_106 : f32 to vector<8x128xf32>
    %302 = arith.addf %301, %300 : vector<8x128xf32>
    %303 = arith.divf %301, %302 : vector<8x128xf32>
    %c0_107 = arith.constant 0 : index
    %c0_108 = arith.constant 0 : index
    %c256_109 = arith.constant 256 : index
    %304 = vector.load %arg3[%c0_107, %c0_108, %c256_109] : memref<1x128x384xf32, #tpu.memory_space<vmem>>, vector<1x128x128xf32>
    %305 = vector.shape_cast %304 : vector<1x128x128xf32> to vector<128x128xf32>
    %cst_110 = arith.constant dense<0.000000e+00> : vector<8x128xf32>
    %306 = tpu.matmul %276, %305, %cst_110 {dimension_numbers = #tpu.dot_dimension_numbers<[1], [0], [0], [1], [0, 0, 1, 1], [], []>} : vector<8x128xf32>, vector<128x128xf32>, vector<8x128xf32> -> vector<8x128xf32>
    %307 = arith.addf %306, %5 : vector<8x128xf32>
    %308 = vector.extract_strided_slice %284 {offsets = [0, 256], sizes = [8, 128], strides = [1, 1]} : vector<8x384xf32> to vector<8x128xf32>
    %309 = arith.mulf %295, %307 : vector<8x128xf32>
    %310 = arith.addf %308, %309 : vector<8x128xf32>
    %311 = math.tanh %310 : vector<8x128xf32>
    %312 = arith.subf %276, %311 : vector<8x128xf32>
    %313 = arith.mulf %303, %312 : vector<8x128xf32>
    %314 = arith.addf %311, %313 : vector<8x128xf32>
    %315 = arith.addi %8, %282 : i32
    %316 = tpu.assume_multiple %315, 8 : i32
    %317 = arith.index_cast %316 : i32 to index
    %c0_111 = arith.constant 0 : index
    %318 = vector.load %arg10[%317, %c0_111] : memref<64x128xf32, #tpu.memory_space<vmem>>, vector<8x128xf32>
    tpu.vector_store %arg10[%317, %c0_111], %314 {strides = array<i32>} : memref<64x128xf32, #tpu.memory_space<vmem>>, vector<8x128xf32>,
    %c8_i32_112 = arith.constant 8 : i32
    %c1_i32_113 = arith.constant 1 : i32
    %c1_i32_114 = arith.constant 1 : i32
    %319 = arith.cmpi eq, %arg0, %c1_i32_114 : i32
    %320 = arith.extui %319 : i1 to i32
    %c0_i32_115 = arith.constant 0 : i32
    %321 = arith.cmpi ne, %320, %c0_i32_115 : i32
    scf.if %321 {
      %c0_116 = arith.constant 0 : index
      %c0_117 = arith.constant 0 : index
      %322 = vector.load %arg6[%c0_116, %c0_117] : memref<128x128xf32, #tpu.memory_space<vmem>>, vector<128x128xf32>
      %cst_118 = arith.constant dense<0.000000e+00> : vector<8x128xf32>
      %323 = tpu.matmul %314, %322, %cst_118 {dimension_numbers = #tpu.dot_dimension_numbers<[1], [0], [0], [1], [0, 0, 1, 1], [], []>} : vector<8x128xf32>, vector<128x128xf32>, vector<8x128xf32> -> vector<8x128xf32>
      %c0_119 = arith.constant 0 : index
      %c0_120 = arith.constant 0 : index
      %324 = vector.load %arg7[%c0_119, %c0_120] : memref<1x128xf32, #tpu.memory_space<vmem>>, vector<1x128xf32>
      %325 = vector.broadcast %324 : vector<1x128xf32> to vector<8x128xf32>
      %326 = arith.addf %323, %325 : vector<8x128xf32>
      %c0_121 = arith.constant 0 : index
      %c0_122 = arith.constant 0 : index
      %327 = vector.load %arg8[%c0_121, %c0_122] : memref<8x128xf32, #tpu.memory_space<vmem>>, vector<8x128xf32>
      tpu.vector_store %arg8[%c0_121, %c0_122], %326 {strides = array<i32>} : memref<8x128xf32, #tpu.memory_space<vmem>>, vector<8x128xf32>,
    } else {
    }
    return
  }
  func.func @transform_0(%arg0: i32) -> (i32, i32) {
    %c0_i32 = arith.constant 0 : i32
    %c0_i32_0 = arith.constant 0 : i32
    %c0_i32_1 = arith.constant 0 : i32
    return %c0_i32, %c0_i32_0 : i32, i32
  }
  func.func @transform_1(%arg0: i32) -> (i32, i32, i32) {
    %c0_i32 = arith.constant 0 : i32
    %c0_i32_0 = arith.constant 0 : i32
    %c0_i32_1 = arith.constant 0 : i32
    return %arg0, %c0_i32, %c0_i32_0 : i32, i32, i32
  }
  func.func @transform_2(%arg0: i32) -> (i32, i32, i32) {
    %c0_i32 = arith.constant 0 : i32
    %c0_i32_0 = arith.constant 0 : i32
    %c0_i32_1 = arith.constant 0 : i32
    return %arg0, %c0_i32, %c0_i32_0 : i32, i32, i32
  }
  func.func @transform_3(%arg0: i32) -> (i32, i32, i32) {
    %c0_i32 = arith.constant 0 : i32
    %c0_i32_0 = arith.constant 0 : i32
    %c0_i32_1 = arith.constant 0 : i32
    return %arg0, %c0_i32, %c0_i32_0 : i32, i32, i32
  }
  func.func @transform_4(%arg0: i32) -> (i32, i32, i32) {
    %c0_i32 = arith.constant 0 : i32
    %c0_i32_0 = arith.constant 0 : i32
    %c0_i32_1 = arith.constant 0 : i32
    return %arg0, %c0_i32, %c0_i32_0 : i32, i32, i32
  }
  func.func @transform_5(%arg0: i32) -> (i32, i32) {
    %c0_i32 = arith.constant 0 : i32
    %c0_i32_0 = arith.constant 0 : i32
    %c0_i32_1 = arith.constant 0 : i32
    return %c0_i32, %c0_i32_0 : i32, i32
  }
  func.func @transform_6(%arg0: i32) -> (i32, i32) {
    %c0_i32 = arith.constant 0 : i32
    %c0_i32_0 = arith.constant 0 : i32
    %c0_i32_1 = arith.constant 0 : i32
    return %c0_i32, %c0_i32_0 : i32, i32
  }
  func.func @transform_7(%arg0: i32) -> (i32, i32) {
    %c0_i32 = arith.constant 0 : i32
    %c0_i32_0 = arith.constant 0 : i32
    %c0_i32_1 = arith.constant 0 : i32
    return %c0_i32, %c0_i32_0 : i32, i32
  }
}

</mosaic_0001>

<bundles_post_ra>
// kernel: simple_gru_forward.1
= control target key start
LH: loop header
LB: loop body
LE: loop exit
PB: predicated region body
PF: predicated region fallthrough
CT: control target
= control target key end

     0   :  { %s3659_s24 = smov 0   ;;  %s4803_s0 = inlined_call_operand.vmem [shape: f32[64,128], index: 0, kind: input, shape index: {}]   ;;  %s4804_s1 = inlined_call_operand.vmem [shape: f32[2,128,384], index: 1, kind: input, shape index: {}]   ;;  %s4805_s2 = inlined_call_operand.vmem [shape: f32[2,128,384], index: 2, kind: input, shape index: {}]   ;;  %s4806_s3 = inlined_call_operand.vmem [shape: f32[2,1,384], index: 3, kind: input, shape index: {}]   ;;  %s4807_s4 = inlined_call_operand.vmem [shape: f32[2,1,128], index: 4, kind: input, shape index: {}]   ;;  %s4808_s5 = inlined_call_operand.vmem [shape: f32[128,128], index: 5, kind: input, shape index: {}]   ;;  %s4809_s6 = inlined_call_operand.vmem [shape: f32[1,128], index: 6, kind: input, shape index: {}]   ;;  %s4810_s7 = inlined_call_operand.vmem [shape: f32[8,128], index: 7, kind: output, shape index: {}]  }
   0x1 LB: > { %s3665_s25 = sadd.s32 4294967295, %s3611_s24   ;;  %p2879_p0 = scmp.ge.s32.totalorder %s3611_s24, 1  ;;  %s3611_s24 = sphi %s3659_s24, %s17_s24  }
   0x2   : > { %p259_p1 = scmp.lt.s32.totalorder %s3611_s24, 3 }
   0x4   : > { %p260_p2 = pnand %p2879_p0, %p259_p1 }
   0x6   : > { %263 = sbr.rel (%p260_p2) target bundleno = 2819 (0xb03), region = 48 }
   0xb   : > { %p298_p3 = scmp.lt.s32.totalorder %s3665_s25, 1  ;;  %p2883_p4 = scmp.ne.s32.totalorder %s3665_s25, 0 }
   0xd   : > { %s299_s26 = scalar_select %p298_p3, %s3665_s25, 1 }
   0xf   : > { %s3509_s27 = smul.u32 384, %s299_s26  ;;  %s314_s30 = scalar_lea.vmem %s4807_s4, %s299_s26 }
  0x10   : > { %s3510_s8 = smul.u32 3, %s299_s26  ;;  %v3674_v0 = vld [vmem:[%s314_s30] ss:$0 sm:$0xff] }
  0x11   : > { %s3679_s11 = scalar_lea.vmem %s4804_s1, %s3509_s27  ;;  %s3684_s14 = scalar_lea.vmem %s4805_s2, %s3509_s27 }
  0x12   : > { %s311_s17 = scalar_lea.vmem %s4806_s3, %s3510_s8  ;;  %326 = sbr.rel (%p2883_p4) target bundleno = 282 (0x11a), region = 52 }
  0x13   : > { %v3689_v1 = vld [vmem:[%s311_s17] sm:$0x7] }
  0x17   : > { %v381_v2 = vld [vmem:[%s3679_s11 + $0x170] sm:$0xff]  ;;  %v380_v3 = vld [vmem:[%s3679_s11 + $0x168] sm:$0xff]  ;;  %v378_v4 = vld [vmem:[%s3679_s11 + $0x158] sm:$0xff]  ;;  %v3613_v6 = vmov 0.0   ;;  %v384_v59 = vlaneseq }
  0x18   : > { %399 = vmatprep.subr.mxu0 %v381_v2  ;;  %v377_v5 = vld [vmem:[%s3679_s11 + $0x150] sm:$0xff]  ;;  %463 = vmatprep.mubr.f32.mxu0 %v3613_v6  ;;  %v375_v7 = vld [vmem:[%s3679_s11 + $0x140] sm:$0xff]  ;;  %v374_v8 = vld [vmem:[%s3679_s11 + $0x138] sm:$0xff] }
  0x19   : > { %400 = vmatpush1.msra.mxu0 %v380_v3  ;;  %v372_v9 = vld [vmem:[%s3679_s11 + $0x128] sm:$0xff]  ;;  %v371_v10 = vld [vmem:[%s3679_s11 + $0x120] sm:$0xff]  ;;  %v382_v11 = vld [vmem:[%s3679_s11 + $0x178] sm:$0xff]  ;;  %v385_v60 = vshrl.u32 %v384_v59, 7 }
  0x1a   : > { %401 = vmatprep.subr.mxu0 %v378_v4  ;;  %v369_v12 = vld [vmem:[%s3679_s11 + $0x110] sm:$0xff]  ;;  %3106 = vmatprep.subr.mxu1 %v382_v11  ;;  %v379_v13 = vld [vmem:[%s3679_s11 + $0x160] sm:$0xff]  ;;  %v368_v14 = vld [vmem:[%s3679_s11 + $0x108] sm:$0xff] }
  0x1b   : > { %402 = vmatpush1.msra.mxu0 %v377_v5  ;;  %3107 = vmatpush3.msra.mxu1 %v382_v11  ;;  %v376_v15 = vld [vmem:[%s3679_s11 + $0x148] sm:$0xff]  ;;  %v366_v16 = vld [vmem:[%s3679_s11 + $0xf8] sm:$0xff]  ;;  %v365_v17 = vld [vmem:[%s3679_s11 + $0xf0] sm:$0xff]  ;;  %v386_v61 = vsub.s32 0, %v385_v60  ;;  %v390_v62 = vsub.s32 1, %v385_v60  ;;  %v394_v2 = vsub.s32 2, %v385_v60 }
  0x1c   : > { %403 = vmatprep.subr.mxu0 %v375_v7  ;;  %3108 = vmatprep.subr.mxu1 %v379_v13  ;;  %v373_v18 = vld [vmem:[%s3679_s11 + $0x130] sm:$0xff]  ;;  %v363_v19 = vld [vmem:[%s3679_s11 + $0xe0] sm:$0xff]  ;;  %v362_v20 = vld [vmem:[%s3679_s11 + $0xd8] sm:$0xff] }
  0x1d   : > { %404 = vmatpush1.msra.mxu0 %v374_v8  ;;  %3109 = vmatpush3.msra.mxu1 %v379_v13  ;;  %v370_v21 = vld [vmem:[%s3679_s11 + $0x118] sm:$0xff]  ;;  %v360_v22 = vld [vmem:[%s3679_s11 + $0xc8] sm:$0xff]  ;;  %v359_v23 = vld [vmem:[%s3679_s11 + $0xc0] sm:$0xff]  ;;  %v3773_v63 = vrot.slane %v3689_v1, %v386_v61  ;;  %v3776_v3 = vrot.slane %v3689_v1, %v390_v62  ;;  %v395_v8 = vrot.slane %v3689_v1, %v394_v2 }
  0x1e   : > { %405 = vmatprep.subr.mxu0 %v372_v9  ;;  %3110 = vmatprep.subr.mxu1 %v376_v15  ;;  %v367_v24 = vld [vmem:[%s3679_s11 + $0x100] sm:$0xff]  ;;  %v357_v25 = vld [vmem:[%s3679_s11 + $0xb0] sm:$0xff]  ;;  %v356_v26 = vld [vmem:[%s3679_s11 + $0xa8] sm:$0xff] }
  0x1f   : > { %406 = vmatpush1.msra.mxu0 %v371_v10  ;;  %3111 = vmatpush3.msra.mxu1 %v376_v15  ;;  %v364_v27 = vld [vmem:[%s3679_s11 + $0xe8] sm:$0xff]  ;;  %v354_v28 = vld [vmem:[%s3679_s11 + $0x98] sm:$0xff]  ;;  %v353_v29 = vld [vmem:[%s3679_s11 + $0x90] sm:$0xff] }
  0x20   : > { %407 = vmatprep.subr.mxu0 %v369_v12  ;;  %3112 = vmatprep.subr.mxu1 %v373_v18  ;;  %v361_v30 = vld [vmem:[%s3679_s11 + $0xd0] sm:$0xff]  ;;  %v351_v31 = vld [vmem:[%s3679_s11 + $0x80] sm:$0xff]  ;;  %v350_v32 = vld [vmem:[%s3679_s11 + $0x78] sm:$0xff] }
  0x21   : > { %408 = vmatpush1.msra.mxu0 %v368_v14  ;;  %3113 = vmatpush3.msra.mxu1 %v373_v18  ;;  %v358_v33 = vld [vmem:[%s3679_s11 + $0xb8] sm:$0xff]  ;;  %v348_v34 = vld [vmem:[%s3679_s11 + $0x68] sm:$0xff]  ;;  %v347_v35 = vld [vmem:[%s3679_s11 + $0x60] sm:$0xff] }
  0x22   : > { %409 = vmatprep.subr.mxu0 %v366_v16  ;;  %3114 = vmatprep.subr.mxu1 %v370_v21  ;;  %v355_v36 = vld [vmem:[%s3679_s11 + $0xa0] sm:$0xff]  ;;  %v345_v37 = vld [vmem:[%s3679_s11 + $0x50] sm:$0xff]  ;;  %v344_v38 = vld [vmem:[%s3679_s11 + $0x48] sm:$0xff] }
  0x23   : > { %410 = vmatpush1.msra.mxu0 %v365_v17  ;;  %3115 = vmatpush3.msra.mxu1 %v370_v21  ;;  %v352_v39 = vld [vmem:[%s3679_s11 + $0x88] sm:$0xff]  ;;  %v342_v40 = vld [vmem:[%s3679_s11 + $0x38] sm:$0xff]  ;;  %v341_v41 = vld [vmem:[%s3679_s11 + $0x30] sm:$0xff] }
  0x24   : > { %411 = vmatprep.subr.mxu0 %v363_v19  ;;  %3116 = vmatprep.subr.mxu1 %v367_v24  ;;  %v349_v42 = vld [vmem:[%s3679_s11 + $0x70] sm:$0xff]  ;;  %v339_v43 = vld [vmem:[%s3679_s11 + $0x20] sm:$0xff]  ;;  %v338_v44 = vld [vmem:[%s3679_s11 + $0x18] sm:$0xff] }
  0x25   : > { %412 = vmatpush1.msra.mxu0 %v362_v20  ;;  %3117 = vmatpush3.msra.mxu1 %v367_v24  ;;  %v346_v45 = vld [vmem:[%s3679_s11 + $0x58] sm:$0xff]  ;;  %v336_v46 = vld [vmem:[%s3679_s11 + $0x8] sm:$0xff]  ;;  %v335_v47 = vld [vmem:[%s3679_s11] sm:$0xff] }
  0x26   : > { %413 = vmatprep.subr.mxu0 %v360_v22  ;;  %3118 = vmatprep.subr.mxu1 %v364_v27  ;;  %v343_v48 = vld [vmem:[%s3679_s11 + $0x40] sm:$0xff]  ;;  %v340_v50 = vld [vmem:[%s3679_s11 + $0x28] sm:$0xff]  ;;  %v337_v51 = vld [vmem:[%s3679_s11 + $0x10] sm:$0xff] }
  0x27   : > { %414 = vmatpush1.msra.mxu0 %v359_v23  ;;  %3119 = vmatpush3.msra.mxu1 %v364_v27  ;;  %v327_v49 = vld [vmem:[%s4803_s0] sm:$0xff]  ;;  %v328_v52 = vld [vmem:[%s4803_s0 + $0x8] sm:$0xff]  ;;  %v329_v53 = vld [vmem:[%s4803_s0 + $0x10] sm:$0xff] }
  0x28   : > { %415 = vmatprep.subr.mxu0 %v357_v25  ;;  %3120 = vmatprep.subr.mxu1 %v361_v30  ;;  %v330_v54 = vld [vmem:[%s4803_s0 + $0x18] sm:$0xff]  ;;  %v331_v55 = vld [vmem:[%s4803_s0 + $0x20] sm:$0xff]  ;;  %v333_v56 = vld [vmem:[%s4803_s0 + $0x30] sm:$0xff] }
  0x29   : > { %416 = vmatpush1.msra.mxu0 %v356_v26  ;;  %3121 = vmatpush3.msra.mxu1 %v361_v30  ;;  %v332_v57 = vld [vmem:[%s4803_s0 + $0x28] sm:$0xff]  ;;  %v334_v58 = vld [vmem:[%s4803_s0 + $0x38] sm:$0xff] }
  0x2a   : > { %417 = vmatprep.subr.mxu0 %v354_v28  ;;  %3122 = vmatprep.subr.mxu1 %v358_v33 }
  0x2b   : > { %418 = vmatpush1.msra.mxu0 %v353_v29  ;;  %3123 = vmatpush3.msra.mxu1 %v358_v33 }
  0x2c   : > { %419 = vmatprep.subr.mxu0 %v351_v31  ;;  %3124 = vmatprep.subr.mxu1 %v355_v36 }
  0x2d   : > { %420 = vmatpush1.msra.mxu0 %v350_v32  ;;  %3125 = vmatpush3.msra.mxu1 %v355_v36 }
  0x2e   : > { %421 = vmatprep.subr.mxu0 %v348_v34  ;;  %3126 = vmatprep.subr.mxu1 %v352_v39 }
  0x2f   : > { %422 = vmatpush1.msra.mxu0 %v347_v35  ;;  %3127 = vmatpush3.msra.mxu1 %v352_v39 }
  0x30   : > { %423 = vmatprep.subr.mxu0 %v345_v37  ;;  %3128 = vmatprep.subr.mxu1 %v349_v42 }
  0x31   : > { %424 = vmatpush1.msra.mxu0 %v344_v38  ;;  %3129 = vmatpush3.msra.mxu1 %v349_v42 }
  0x32   : > { %425 = vmatprep.subr.mxu0 %v342_v40  ;;  %3130 = vmatprep.subr.mxu1 %v346_v45 }
  0x33   : > { %426 = vmatpush1.msra.mxu0 %v341_v41  ;;  %3131 = vmatpush3.msra.mxu1 %v346_v45 }
  0x34   : > { %427 = vmatprep.subr.mxu0 %v339_v43  ;;  %3132 = vmatprep.subr.mxu1 %v343_v48 }
  0x35   : > { %428 = vmatpush1.msra.mxu0 %v338_v44  ;;  %3133 = vmatpush3.msra.mxu1 %v343_v48 }
  0x36   : > { %429 = vmatprep.subr.mxu0 %v336_v46  ;;  %3134 = vmatprep.subr.mxu1 %v340_v50 }
  0x37   : > { %430 = vmatpush1.msra.mxu0 %v335_v47  ;;  %3135 = vmatpush3.msra.mxu1 %v340_v50 }
  0x38   : > { %464 = vmatmul.mubr.f32.vlgmr.msra.gmra.mxu0 %v327_v49  ;;  %3138 = vmatprep.mubr.f32.mxu1 %v327_v49 }
  0x39   : > { %469 = vmatprep.mubr.f32.mxu0 %v3613_v6  ;;  %3136 = vmatprep.subr.mxu1 %v337_v51 }
  0x3a   : > { %3137 = vmatpush3.msra.mxu1 %v337_v51 }
  0x3b   : > { %3139 = vmatmul.mubr.f32.vlgmr.msra.gmra.mxu1 %v328_v52 }
  0x3c   : > { %470 = vmatmul.mubr.f32.gmra.mxu0 %v328_v52  ;;  %3141 = vmatprep.mubr.f32.mxu1 %v329_v53 }
  0x3d   : > { %475 = vmatprep.mubr.f32.mxu0 %v3613_v6 }
  0x3f   : > { %3142 = vmatmul.mubr.f32.gmra.mxu1 %v330_v54 }
  0x40   : > { %476 = vmatmul.mubr.f32.gmra.mxu0 %v329_v53  ;;  %3144 = vmatprep.mubr.f32.mxu1 %v331_v55 }
  0x41   : > { %481 = vmatprep.mubr.f32.mxu0 %v3613_v6 }
  0x43   : > { %3145 = vmatmul.mubr.f32.gmra.mxu1 %v332_v57 }
  0x44   : > { %482 = vmatmul.mubr.f32.gmra.mxu0 %v330_v54  ;;  %3147 = vmatprep.mubr.f32.mxu1 %v333_v56 }
  0x45   : > { %487 = vmatprep.mubr.f32.mxu0 %v3613_v6 }
  0x47   : > { %3148 = vmatmul.mubr.f32.gmra.mxu1 %v334_v58 }
  0x48   : > { %488 = vmatmul.mubr.f32.gmra.mxu0 %v331_v55 }
  0x49   : > { %493 = vmatprep.mubr.f32.mxu0 %v3613_v6 }
  0x4c   : > { %494 = vmatmul.mubr.f32.gmra.mxu0 %v332_v57 }
  0x4d   : > { %499 = vmatprep.mubr.f32.mxu0 %v3613_v6 }
  0x50   : > { %500 = vmatmul.mubr.f32.gmra.mxu0 %v333_v56 }
  0x51   : > { %505 = vmatprep.mubr.f32.mxu0 %v3613_v6 }
  0x54   : > { %506 = vmatmul.mubr.f32.gmra.mxu0 %v334_v58 }
  0xf8   : > { %v465_v4 = vpop.f32.mrf.mxu0 }
  0xf9   : > { %v466_v5 = vadd.f32 %v465_v4, %v3773_v63 }
  0xfa   : > { %v467_v7 = vpop.f32.mrf.mxu0 }
  0xfb   : > { %617 = vst [vmem:[#allocation2 + $0xb0] sm:$0xff] %v466_v5  ;;  %v468_v6 = vadd.f32 %v467_v7, %v3776_v3  ;;  %v3140_v11 = vpop.f32.mrf.mxu1 }
  0xfc   : > { %v471_v9 = vpop.f32.mrf.mxu0  ;;  %v584_v13 = vadd.f32 %v3140_v11, %v395_v8 }
  0xfd   : > { %618 = vst [vmem:[#allocation2] sm:$0xff] %v468_v6  ;;  %v472_v10 = vadd.f32 %v471_v9, %v3773_v63  ;;  %v578_v15 = vpop.f32.mrf.mxu1 }
  0xfe   : > { %v473_v12 = vpop.f32.mrf.mxu0  ;;  %622 = vst [vmem:[#allocation2 + $0x28] sm:$0xff] %v584_v13  ;;  %v579_v17 = vadd.f32 %v578_v15, %v395_v8 }
  0xff   : > { %620 = vst [vmem:[#allocation2 + $0x48] sm:$0xff] %v472_v10  ;;  %v474_v14 = vadd.f32 %v473_v12, %v3776_v3  ;;  %v3143_v19 = vpop.f32.mrf.mxu1 }
 0x100   : > { %v477_v16 = vpop.f32.mrf.mxu0  ;;  %619 = vst [vmem:[#allocation2 + $0x10] sm:$0xff] %v579_v17  ;;  %v594_v21 = vadd.f32 %v3143_v19, %v395_v8 }
 0x101   : > { %621 = vst [vmem:[#allocation2 + $0x60] sm:$0xff] %v474_v14  ;;  %v478_v18 = vadd.f32 %v477_v16, %v3773_v63  ;;  %v588_v23 = vpop.f32.mrf.mxu1 }
 0x102   : > { %v479_v20 = vpop.f32.mrf.mxu0  ;;  %628 = vst [vmem:[#allocation2 + $0x98] sm:$0xff] %v594_v21  ;;  %v589_v25 = vadd.f32 %v588_v23, %v395_v8 }
 0x103   : > { %623 = vst [vmem:[#allocation2 + $0x40] sm:$0xff] %v478_v18  ;;  %v480_v22 = vadd.f32 %v479_v20, %v3776_v3  ;;  %v3146_v27 = vpop.f32.mrf.mxu1 }
 0x104   : > { %v483_v24 = vpop.f32.mrf.mxu0  ;;  %625 = vst [vmem:[#allocation2 + $0x88] sm:$0xff] %v589_v25  ;;  %v604_v29 = vadd.f32 %v3146_v27, %v395_v8 }
 0x105   : > { %624 = vst [vmem:[#allocation2 + $0x78] sm:$0xff] %v480_v22  ;;  %v484_v26 = vadd.f32 %v483_v24, %v3773_v63  ;;  %v598_v31 = vpop.f32.mrf.mxu1 }
 0x106   : > { %v485_v28 = vpop.f32.mrf.mxu0  ;;  %634 = vst [vmem:[#allocation2 + $0x68] sm:$0xff] %v604_v29  ;;  %v599_v33 = vadd.f32 %v598_v31, %v395_v8 }
 0x107   : > { %626 = vst [vmem:[#allocation2 + $0x90] sm:$0xff] %v484_v26  ;;  %v486_v30 = vadd.f32 %v485_v28, %v3776_v3  ;;  %v3149_v35 = vpop.f32.mrf.mxu1 }
 0x108   : > { %v489_v32 = vpop.f32.mrf.mxu0  ;;  %631 = vst [vmem:[#allocation2 + $0x70] sm:$0xff] %v599_v33  ;;  %v614_v37 = vadd.f32 %v3149_v35, %v395_v8 }
 0x109   : > { %627 = vst [vmem:[#allocation2 + $0x18] sm:$0xff] %v486_v30  ;;  %v490_v34 = vadd.f32 %v489_v32, %v3773_v63  ;;  %v608_v39 = vpop.f32.mrf.mxu1 }
 0x10a   : > { %v491_v36 = vpop.f32.mrf.mxu0  ;;  %640 = vst [vmem:[#allocation2 + $0x8] sm:$0xff] %v614_v37  ;;  %v609_v41 = vadd.f32 %v608_v39, %v395_v8 }
 0x10b   : > { %629 = vst [vmem:[#allocation2 + $0x38] sm:$0xff] %v490_v34  ;;  %v492_v38 = vadd.f32 %v491_v36, %v3776_v3 }
 0x10c   : > { %v495_v40 = vpop.f32.mrf.mxu0  ;;  %637 = vst [vmem:[#allocation2 + $0x80] sm:$0xff] %v609_v41 }
 0x10d   : > { %630 = vst [vmem:[#allocation2 + $0x50] sm:$0xff] %v492_v38  ;;  %v496_v42 = vadd.f32 %v495_v40, %v3773_v63 }
 0x10e   : > { %v497_v43 = vpop.f32.mrf.mxu0 }
 0x10f   : > { %632 = vst [vmem:[#allocation2 + $0xa0] sm:$0xff] %v496_v42  ;;  %v498_v44 = vadd.f32 %v497_v43, %v3776_v3 }
 0x110   : > { %v501_v45 = vpop.f32.mrf.mxu0 }
 0x111   : > { %633 = vst [vmem:[#allocation2 + $0xa8] sm:$0xff] %v498_v44  ;;  %v502_v46 = vadd.f32 %v501_v45, %v3773_v63 }
 0x112   : > { %v503_v47 = vpop.f32.mrf.mxu0 }
 0x113   : > { %635 = vst [vmem:[#allocation2 + $0x30] sm:$0xff] %v502_v46  ;;  %v504_v48 = vadd.f32 %v503_v47, %v3776_v3 }
 0x114   : > { %v507_v49 = vpop.f32.mrf.mxu0 }
 0x115   : > { %636 = vst [vmem:[#allocation2 + $0x58] sm:$0xff] %v504_v48  ;;  %v508_v50 = vadd.f32 %v507_v49, %v3773_v63 }
 0x116   : > { %v509_v51 = vpop.f32.mrf.mxu0 }
 0x117   : > { %638 = vst [vmem:[#allocation2 + $0xb8] sm:$0xff] %v508_v50  ;;  %v510_v52 = vadd.f32 %v509_v51, %v3776_v3 }
 0x119   : > { %639 = vst [vmem:[#allocation2 + $0x20] sm:$0xff] %v510_v52 }
 0x11a PF: > { %p2884_p5 = scmp.le.s32.totalorder %s3665_s25, 0 }
 0x11c   : > { %644 = sbr.rel (%p2884_p5) target bundleno = 548 (0x224), region = 56 }
 0x121   : > { %v699_v53 = vld [vmem:[%s3679_s11 + $0x170] sm:$0xff]  ;;  %v698_v54 = vld [vmem:[%s3679_s11 + $0x168] sm:$0xff]  ;;  %v696_v55 = vld [vmem:[%s3679_s11 + $0x158] sm:$0xff]  ;;  %v3614_v57 = vmov 0.0   ;;  %v702_v48 = vlaneseq }
 0x122   : > { %717 = vmatprep.subr.mxu0 %v699_v53  ;;  %v695_v56 = vld [vmem:[%s3679_s11 + $0x150] sm:$0xff]  ;;  %781 = vmatprep.mubr.f32.mxu0 %v3614_v57  ;;  %v693_v58 = vld [vmem:[%s3679_s11 + $0x140] sm:$0xff]  ;;  %v692_v59 = vld [vmem:[%s3679_s11 + $0x138] sm:$0xff] }
 0x123   : > { %718 = vmatpush1.msra.mxu0 %v698_v54  ;;  %v690_v60 = vld [vmem:[%s3679_s11 + $0x128] sm:$0xff]  ;;  %v689_v61 = vld [vmem:[%s3679_s11 + $0x120] sm:$0xff]  ;;  %v700_v62 = vld [vmem:[%s3679_s11 + $0x178] sm:$0xff]  ;;  %v703_v49 = vshrl.u32 %v702_v48, 7 }
 0x124   : > { %719 = vmatprep.subr.mxu0 %v696_v55  ;;  %v687_v63 = vld [vmem:[%s3679_s11 + $0x110] sm:$0xff]  ;;  %3150 = vmatprep.subr.mxu1 %v700_v62  ;;  %v697_v2 = vld [vmem:[%s3679_s11 + $0x160] sm:$0xff]  ;;  %v686_v3 = vld [vmem:[%s3679_s11 + $0x108] sm:$0xff] }
 0x125   : > { %720 = vmatpush1.msra.mxu0 %v695_v56  ;;  %3151 = vmatpush3.msra.mxu1 %v700_v62  ;;  %v694_v4 = vld [vmem:[%s3679_s11 + $0x148] sm:$0xff]  ;;  %v684_v5 = vld [vmem:[%s3679_s11 + $0xf8] sm:$0xff]  ;;  %v683_v7 = vld [vmem:[%s3679_s11 + $0xf0] sm:$0xff]  ;;  %v704_v50 = vsub.s32 0, %v703_v49  ;;  %v708_v51 = vsub.s32 1, %v703_v49  ;;  %v712_v53 = vsub.s32 2, %v703_v49 }
 0x126   : > { %721 = vmatprep.subr.mxu0 %v693_v58  ;;  %3152 = vmatprep.subr.mxu1 %v697_v2  ;;  %v691_v8 = vld [vmem:[%s3679_s11 + $0x130] sm:$0xff]  ;;  %v681_v6 = vld [vmem:[%s3679_s11 + $0xe0] sm:$0xff]  ;;  %v680_v9 = vld [vmem:[%s3679_s11 + $0xd8] sm:$0xff] }
 0x127   : > { %722 = vmatpush1.msra.mxu0 %v692_v59  ;;  %3153 = vmatpush3.msra.mxu1 %v697_v2  ;;  %v688_v10 = vld [vmem:[%s3679_s11 + $0x118] sm:$0xff]  ;;  %v678_v11 = vld [vmem:[%s3679_s11 + $0xc8] sm:$0xff]  ;;  %v677_v12 = vld [vmem:[%s3679_s11 + $0xc0] sm:$0xff]  ;;  %v3853_v52 = vrot.slane %v3689_v1, %v704_v50  ;;  %v3856_v54 = vrot.slane %v3689_v1, %v708_v51  ;;  %v713_v59 = vrot.slane %v3689_v1, %v712_v53 }
 0x128   : > { %723 = vmatprep.subr.mxu0 %v690_v60  ;;  %3154 = vmatprep.subr.mxu1 %v694_v4  ;;  %v685_v13 = vld [vmem:[%s3679_s11 + $0x100] sm:$0xff]  ;;  %v675_v14 = vld [vmem:[%s3679_s11 + $0xb0] sm:$0xff]  ;;  %v674_v15 = vld [vmem:[%s3679_s11 + $0xa8] sm:$0xff] }
 0x129   : > { %724 = vmatpush1.msra.mxu0 %v689_v61  ;;  %3155 = vmatpush3.msra.mxu1 %v694_v4  ;;  %v682_v16 = vld [vmem:[%s3679_s11 + $0xe8] sm:$0xff]  ;;  %v672_v17 = vld [vmem:[%s3679_s11 + $0x98] sm:$0xff]  ;;  %v671_v18 = vld [vmem:[%s3679_s11 + $0x90] sm:$0xff] }
 0x12a   : > { %725 = vmatprep.subr.mxu0 %v687_v63  ;;  %3156 = vmatprep.subr.mxu1 %v691_v8  ;;  %v679_v19 = vld [vmem:[%s3679_s11 + $0xd0] sm:$0xff]  ;;  %v669_v20 = vld [vmem:[%s3679_s11 + $0x80] sm:$0xff]  ;;  %v668_v21 = vld [vmem:[%s3679_s11 + $0x78] sm:$0xff] }
 0x12b   : > { %726 = vmatpush1.msra.mxu0 %v686_v3  ;;  %3157 = vmatpush3.msra.mxu1 %v691_v8  ;;  %v676_v22 = vld [vmem:[%s3679_s11 + $0xb8] sm:$0xff]  ;;  %v666_v23 = vld [vmem:[%s3679_s11 + $0x68] sm:$0xff]  ;;  %v665_v24 = vld [vmem:[%s3679_s11 + $0x60] sm:$0xff] }
 0x12c   : > { %727 = vmatprep.subr.mxu0 %v684_v5  ;;  %3158 = vmatprep.subr.mxu1 %v688_v10  ;;  %v673_v25 = vld [vmem:[%s3679_s11 + $0xa0] sm:$0xff]  ;;  %v663_v26 = vld [vmem:[%s3679_s11 + $0x50] sm:$0xff]  ;;  %v662_v27 = vld [vmem:[%s3679_s11 + $0x48] sm:$0xff] }
 0x12d   : > { %728 = vmatpush1.msra.mxu0 %v683_v7  ;;  %3159 = vmatpush3.msra.mxu1 %v688_v10  ;;  %v670_v28 = vld [vmem:[%s3679_s11 + $0x88] sm:$0xff]  ;;  %v660_v29 = vld [vmem:[%s3679_s11 + $0x38] sm:$0xff]  ;;  %v659_v30 = vld [vmem:[%s3679_s11 + $0x30] sm:$0xff] }
 0x12e   : > { %729 = vmatprep.subr.mxu0 %v681_v6  ;;  %3160 = vmatprep.subr.mxu1 %v685_v13  ;;  %v667_v31 = vld [vmem:[%s3679_s11 + $0x70] sm:$0xff]  ;;  %v657_v32 = vld [vmem:[%s3679_s11 + $0x20] sm:$0xff]  ;;  %v656_v33 = vld [vmem:[%s3679_s11 + $0x18] sm:$0xff] }
 0x12f   : > { %730 = vmatpush1.msra.mxu0 %v680_v9  ;;  %3161 = vmatpush3.msra.mxu1 %v685_v13  ;;  %v664_v34 = vld [vmem:[%s3679_s11 + $0x58] sm:$0xff]  ;;  %v654_v35 = vld [vmem:[%s3679_s11 + $0x8] sm:$0xff]  ;;  %v653_v36 = vld [vmem:[%s3679_s11] sm:$0xff] }
 0x130   : > { %731 = vmatprep.subr.mxu0 %v678_v11  ;;  %3162 = vmatprep.subr.mxu1 %v682_v16  ;;  %v661_v37 = vld [vmem:[%s3679_s11 + $0x40] sm:$0xff]  ;;  %v645_v38 = vld [vmem:[#allocation3 + $0x30] sm:$0xff]  ;;  %v658_v39 = vld [vmem:[%s3679_s11 + $0x28] sm:$0xff] }
 0x131   : > { %732 = vmatpush1.msra.mxu0 %v677_v12  ;;  %3163 = vmatpush3.msra.mxu1 %v682_v16  ;;  %v655_v40 = vld [vmem:[%s3679_s11 + $0x10] sm:$0xff]  ;;  %v646_v41 = vld [vmem:[#allocation3 + $0x8] sm:$0xff]  ;;  %v647_v42 = vld [vmem:[#allocation3 + $0x20] sm:$0xff] }
 0x132   : > { %733 = vmatprep.subr.mxu0 %v675_v14  ;;  %3164 = vmatprep.subr.mxu1 %v679_v19  ;;  %v648_v43 = vld [vmem:[#allocation3] sm:$0xff]  ;;  %v649_v44 = vld [vmem:[#allocation3 + $0x10] sm:$0xff]  ;;  %v651_v45 = vld [vmem:[#allocation3 + $0x28] sm:$0xff] }
 0x133   : > { %734 = vmatpush1.msra.mxu0 %v674_v15  ;;  %3165 = vmatpush3.msra.mxu1 %v679_v19  ;;  %v650_v46 = vld [vmem:[#allocation3 + $0x38] sm:$0xff] }
 0x134   : > { %735 = vmatprep.subr.mxu0 %v672_v17  ;;  %3166 = vmatprep.subr.mxu1 %v676_v22  ;;  %v652_v47 = vld [vmem:[#allocation3 + $0x18] sm:$0xff] }
 0x135   : > { %736 = vmatpush1.msra.mxu0 %v671_v18  ;;  %3167 = vmatpush3.msra.mxu1 %v676_v22 }
 0x136   : > { %737 = vmatprep.subr.mxu0 %v669_v20  ;;  %3168 = vmatprep.subr.mxu1 %v673_v25 }
 0x137   : > { %738 = vmatpush1.msra.mxu0 %v668_v21  ;;  %3169 = vmatpush3.msra.mxu1 %v673_v25 }
 0x138   : > { %739 = vmatprep.subr.mxu0 %v666_v23  ;;  %3170 = vmatprep.subr.mxu1 %v670_v28 }
 0x139   : > { %740 = vmatpush1.msra.mxu0 %v665_v24  ;;  %3171 = vmatpush3.msra.mxu1 %v670_v28 }
 0x13a   : > { %741 = vmatprep.subr.mxu0 %v663_v26  ;;  %3172 = vmatprep.subr.mxu1 %v667_v31 }
 0x13b   : > { %742 = vmatpush1.msra.mxu0 %v662_v27  ;;  %3173 = vmatpush3.msra.mxu1 %v667_v31 }
 0x13c   : > { %743 = vmatprep.subr.mxu0 %v660_v29  ;;  %3174 = vmatprep.subr.mxu1 %v664_v34 }
 0x13d   : > { %744 = vmatpush1.msra.mxu0 %v659_v30  ;;  %3175 = vmatpush3.msra.mxu1 %v664_v34 }
 0x13e   : > { %745 = vmatprep.subr.mxu0 %v657_v32  ;;  %3176 = vmatprep.subr.mxu1 %v661_v37 }
 0x13f   : > { %746 = vmatpush1.msra.mxu0 %v656_v33  ;;  %3177 = vmatpush3.msra.mxu1 %v661_v37 }
 0x140   : > { %747 = vmatprep.subr.mxu0 %v654_v35  ;;  %3178 = vmatprep.subr.mxu1 %v658_v39 }
 0x141   : > { %748 = vmatpush1.msra.mxu0 %v653_v36  ;;  %3179 = vmatpush3.msra.mxu1 %v658_v39 }
 0x142   : > { %782 = vmatmul.mubr.f32.vlgmr.msra.gmra.mxu0 %v645_v38  ;;  %3182 = vmatprep.mubr.f32.mxu1 %v645_v38 }
 0x143   : > { %787 = vmatprep.mubr.f32.mxu0 %v3614_v57  ;;  %3180 = vmatprep.subr.mxu1 %v655_v40 }
 0x144   : > { %3181 = vmatpush3.msra.mxu1 %v655_v40 }
 0x145   : > { %3183 = vmatmul.mubr.f32.vlgmr.msra.gmra.mxu1 %v646_v41 }
 0x146   : > { %788 = vmatmul.mubr.f32.gmra.mxu0 %v646_v41  ;;  %3185 = vmatprep.mubr.f32.mxu1 %v647_v42 }
 0x147   : > { %793 = vmatprep.mubr.f32.mxu0 %v3614_v57 }
 0x149   : > { %3186 = vmatmul.mubr.f32.gmra.mxu1 %v648_v43 }
 0x14a   : > { %794 = vmatmul.mubr.f32.gmra.mxu0 %v647_v42  ;;  %3188 = vmatprep.mubr.f32.mxu1 %v649_v44 }
 0x14b   : > { %799 = vmatprep.mubr.f32.mxu0 %v3614_v57 }
 0x14d   : > { %3189 = vmatmul.mubr.f32.gmra.mxu1 %v650_v46 }
 0x14e   : > { %800 = vmatmul.mubr.f32.gmra.mxu0 %v648_v43  ;;  %3191 = vmatprep.mubr.f32.mxu1 %v651_v45 }
 0x14f   : > { %805 = vmatprep.mubr.f32.mxu0 %v3614_v57 }
 0x151   : > { %3192 = vmatmul.mubr.f32.gmra.mxu1 %v652_v47 }
 0x152   : > { %806 = vmatmul.mubr.f32.gmra.mxu0 %v649_v44 }
 0x153   : > { %811 = vmatprep.mubr.f32.mxu0 %v3614_v57 }
 0x156   : > { %812 = vmatmul.mubr.f32.gmra.mxu0 %v650_v46 }
 0x157   : > { %817 = vmatprep.mubr.f32.mxu0 %v3614_v57 }
 0x15a   : > { %818 = vmatmul.mubr.f32.gmra.mxu0 %v651_v45 }
 0x15b   : > { %823 = vmatprep.mubr.f32.mxu0 %v3614_v57 }
 0x15e   : > { %824 = vmatmul.mubr.f32.gmra.mxu0 %v652_v47 }
 0x202   : > { %v783_v55 = vpop.f32.mrf.mxu0 }
 0x203   : > { %v784_v56 = vadd.f32 %v783_v55, %v3853_v52 }
 0x204   : > { %v785_v58 = vpop.f32.mrf.mxu0 }
 0x205   : > { %935 = vst [vmem:[#allocation2 + $0xb0] sm:$0xff] %v784_v56  ;;  %v786_v57 = vadd.f32 %v785_v58, %v3856_v54  ;;  %v3184_v62 = vpop.f32.mrf.mxu1 }
 0x206   : > { %v789_v60 = vpop.f32.mrf.mxu0  ;;  %v902_v2 = vadd.f32 %v3184_v62, %v713_v59 }
 0x207   : > { %936 = vst [vmem:[#allocation2] sm:$0xff] %v786_v57  ;;  %v790_v61 = vadd.f32 %v789_v60, %v3853_v52  ;;  %v896_v4 = vpop.f32.mrf.mxu1 }
 0x208   : > { %v791_v63 = vpop.f32.mrf.mxu0  ;;  %940 = vst [vmem:[#allocation2 + $0x28] sm:$0xff] %v902_v2  ;;  %v897_v7 = vadd.f32 %v896_v4, %v713_v59 }
 0x209   : > { %938 = vst [vmem:[#allocation2 + $0x48] sm:$0xff] %v790_v61  ;;  %v792_v3 = vadd.f32 %v791_v63, %v3856_v54  ;;  %v3187_v8 = vpop.f32.mrf.mxu1 }
 0x20a   : > { %v795_v5 = vpop.f32.mrf.mxu0  ;;  %937 = vst [vmem:[#allocation2 + $0x10] sm:$0xff] %v897_v7  ;;  %v912_v9 = vadd.f32 %v3187_v8, %v713_v59 }
 0x20b   : > { %939 = vst [vmem:[#allocation2 + $0x60] sm:$0xff] %v792_v3  ;;  %v796_v1 = vadd.f32 %v795_v5, %v3853_v52  ;;  %v906_v11 = vpop.f32.mrf.mxu1 }
 0x20c   : > { %v797_v6 = vpop.f32.mrf.mxu0  ;;  %946 = vst [vmem:[#allocation2 + $0x98] sm:$0xff] %v912_v9  ;;  %v907_v13 = vadd.f32 %v906_v11, %v713_v59 }
 0x20d   : > { %941 = vst [vmem:[#allocation2 + $0x40] sm:$0xff] %v796_v1  ;;  %v798_v10 = vadd.f32 %v797_v6, %v3856_v54  ;;  %v3190_v15 = vpop.f32.mrf.mxu1 }
 0x20e   : > { %v801_v12 = vpop.f32.mrf.mxu0  ;;  %943 = vst [vmem:[#allocation2 + $0x88] sm:$0xff] %v907_v13  ;;  %v922_v17 = vadd.f32 %v3190_v15, %v713_v59 }
 0x20f   : > { %942 = vst [vmem:[#allocation2 + $0x78] sm:$0xff] %v798_v10  ;;  %v802_v14 = vadd.f32 %v801_v12, %v3853_v52  ;;  %v916_v19 = vpop.f32.mrf.mxu1 }
 0x210   : > { %v803_v16 = vpop.f32.mrf.mxu0  ;;  %952 = vst [vmem:[#allocation2 + $0x68] sm:$0xff] %v922_v17  ;;  %v917_v21 = vadd.f32 %v916_v19, %v713_v59 }
 0x211   : > { %944 = vst [vmem:[#allocation2 + $0x90] sm:$0xff] %v802_v14  ;;  %v804_v18 = vadd.f32 %v803_v16, %v3856_v54  ;;  %v3193_v23 = vpop.f32.mrf.mxu1 }
 0x212   : > { %v807_v20 = vpop.f32.mrf.mxu0  ;;  %949 = vst [vmem:[#allocation2 + $0x70] sm:$0xff] %v917_v21  ;;  %v932_v25 = vadd.f32 %v3193_v23, %v713_v59 }
 0x213   : > { %945 = vst [vmem:[#allocation2 + $0x18] sm:$0xff] %v804_v18  ;;  %v808_v22 = vadd.f32 %v807_v20, %v3853_v52  ;;  %v926_v27 = vpop.f32.mrf.mxu1 }
 0x214   : > { %v809_v24 = vpop.f32.mrf.mxu0  ;;  %958 = vst [vmem:[#allocation2 + $0x8] sm:$0xff] %v932_v25  ;;  %v927_v29 = vadd.f32 %v926_v27, %v713_v59 }
 0x215   : > { %947 = vst [vmem:[#allocation2 + $0x38] sm:$0xff] %v808_v22  ;;  %v810_v26 = vadd.f32 %v809_v24, %v3856_v54 }
 0x216   : > { %v813_v28 = vpop.f32.mrf.mxu0  ;;  %955 = vst [vmem:[#allocation2 + $0x80] sm:$0xff] %v927_v29 }
 0x217   : > { %948 = vst [vmem:[#allocation2 + $0x50] sm:$0xff] %v810_v26  ;;  %v814_v30 = vadd.f32 %v813_v28, %v3853_v52 }
 0x218   : > { %v815_v31 = vpop.f32.mrf.mxu0 }
 0x219   : > { %950 = vst [vmem:[#allocation2 + $0xa0] sm:$0xff] %v814_v30  ;;  %v816_v32 = vadd.f32 %v815_v31, %v3856_v54 }
 0x21a   : > { %v819_v33 = vpop.f32.mrf.mxu0 }
 0x21b   : > { %951 = vst [vmem:[#allocation2 + $0xa8] sm:$0xff] %v816_v32  ;;  %v820_v34 = vadd.f32 %v819_v33, %v3853_v52 }
 0x21c   : > { %v821_v35 = vpop.f32.mrf.mxu0 }
 0x21d   : > { %953 = vst [vmem:[#allocation2 + $0x30] sm:$0xff] %v820_v34  ;;  %v822_v36 = vadd.f32 %v821_v35, %v3856_v54 }
 0x21e   : > { %v825_v37 = vpop.f32.mrf.mxu0 }
 0x21f   : > { %954 = vst [vmem:[#allocation2 + $0x58] sm:$0xff] %v822_v36  ;;  %v826_v38 = vadd.f32 %v825_v37, %v3853_v52 }
 0x220   : > { %v827_v39 = vpop.f32.mrf.mxu0 }
 0x221   : > { %956 = vst [vmem:[#allocation2 + $0xb8] sm:$0xff] %v826_v38  ;;  %v828_v40 = vadd.f32 %v827_v39, %v3856_v54 }
 0x223   : > { %957 = vst [vmem:[#allocation2 + $0x20] sm:$0xff] %v828_v40 }
 0x224 PF: > { %v3876_v41 = vld [vmem:[%s3684_s14 + $0x170] sm:$0xff]  ;;  %v3879_v42 = vld [vmem:[%s3684_s14 + $0x168] sm:$0xff]  ;;  %v3882_v43 = vld [vmem:[%s3684_s14 + $0x158] sm:$0xff]  ;;  %v4812_v45 = vmov 0.0   ;;  %vm3616_vm0 = vmmov 0   ;;  %p2901_p6 = scmp.ne.s32.totalorder %s3665_s25, 1 }
 0x225   : > { %4832 = vst [vmem:[#allocation4_spill] sm:$0xff] %v3876_v41  ;;  %997 = vmatprep.subr.mxu0 %v3876_v41  ;;  %v3886_v44 = vld [vmem:[%s3684_s14 + $0x150] sm:$0xff]  ;;  %3194 = vmatprep.subr.mxu1 %v4812_v45  ;;  %v3891_v46 = vld [vmem:[%s3684_s14 + $0x140] sm:$0xff]  ;;  %v3896_v47 = vld [vmem:[%s3684_s14 + $0x138] sm:$0xff] }
 0x226   : > { %998 = vmatpush1.msra.mxu0 %v3879_v42  ;;  %1061 = vmatprep.mubr.f32.mxu0 %v4812_v45  ;;  %v3902_v48 = vld [vmem:[%s3684_s14 + $0x128] sm:$0xff]  ;;  %v3906_v49 = vld [vmem:[%s3684_s14 + $0x120] sm:$0xff]  ;;  %v3910_v50 = vld [vmem:[%s3684_s14 + $0x110] sm:$0xff] }
 0x227   : > { %999 = vmatprep.subr.mxu0 %v3882_v43  ;;  %3226 = vmatprep.mubr.msk.f32.mxu1 %vm3616_vm0, %v4812_v45  ;;  %v3914_v51 = vld [vmem:[%s3684_s14 + $0x108] sm:$0xff]  ;;  %v3918_v52 = vld [vmem:[%s3684_s14 + $0xf8] sm:$0xff]  ;;  %v3922_v53 = vld [vmem:[%s3684_s14 + $0xf0] sm:$0xff] }
 0x228   : > { %1000 = vmatpush1.msra.mxu0 %v3886_v44  ;;  %v3926_v54 = vld [vmem:[%s3684_s14 + $0xe0] sm:$0xff]  ;;  %v3929_v55 = vld [vmem:[%s3684_s14 + $0x178] sm:$0xff]  ;;  %v3941_v59 = vld [vmem:[%s3684_s14 + $0xc8] sm:$0xff] }
 0x229   : > { %1001 = vmatprep.subr.mxu0 %v3891_v46  ;;  %v3933_v56 = vld [vmem:[%s3684_s14 + $0xd8] sm:$0xff]  ;;  %3195 = vmatpush3.msra.mxu1 %v3929_v55  ;;  %v3937_v58 = vld [vmem:[%s3684_s14 + $0x160] sm:$0xff]  ;;  %v3945_v57 = vld [vmem:[%s3684_s14 + $0x148] sm:$0xff] }
 0x22a   : > { %1002 = vmatpush1.msra.mxu0 %v3896_v47  ;;  %3196 = vmatprep.subr.mxu1 %v4812_v45  ;;  %v3949_v60 = vld [vmem:[%s3684_s14 + $0xc0] sm:$0xff]  ;;  %v3954_v61 = vld [vmem:[%s3684_s14 + $0xb0] sm:$0xff]  ;;  %v3962_v63 = vld [vmem:[%s3684_s14 + $0xa8] sm:$0xff] }
 0x22b   : > { %1003 = vmatprep.subr.mxu0 %v3902_v48  ;;  %3197 = vmatpush3.msra.mxu1 %v3937_v58  ;;  %v3958_v62 = vld [vmem:[%s3684_s14 + $0x130] sm:$0xff]  ;;  %v3967_v2 = vld [vmem:[%s3684_s14 + $0x98] sm:$0xff]  ;;  %v3980_v5 = vld [vmem:[%s3684_s14 + $0x80] sm:$0xff] }
 0x22c   : > { %1004 = vmatpush1.msra.mxu0 %v3906_v49  ;;  %3198 = vmatprep.subr.mxu1 %v4812_v45  ;;  %v3971_v3 = vld [vmem:[%s3684_s14 + $0x118] sm:$0xff]  ;;  %v3975_v4 = vld [vmem:[%s3684_s14 + $0x90] sm:$0xff]  ;;  %v3984_v7 = vld [vmem:[%s3684_s14 + $0x100] sm:$0xff] }
 0x22d   : > { %1005 = vmatprep.subr.mxu0 %v3910_v50  ;;  %3199 = vmatpush3.msra.mxu1 %v3945_v57  ;;  %v3988_v1 = vld [vmem:[%s3684_s14 + $0x78] sm:$0xff]  ;;  %v3993_v8 = vld [vmem:[%s3684_s14 + $0x68] sm:$0xff]  ;;  %v4001_v9 = vld [vmem:[%s3684_s14 + $0x60] sm:$0xff] }
 0x22e   : > { %1006 = vmatpush1.msra.mxu0 %v3914_v51  ;;  %3200 = vmatprep.subr.mxu1 %v4812_v45  ;;  %v3997_v6 = vld [vmem:[%s3684_s14 + $0xe8] sm:$0xff]  ;;  %v4006_v10 = vld [vmem:[%s3684_s14 + $0x50] sm:$0xff]  ;;  %v4019_v13 = vld [vmem:[%s3684_s14 + $0x38] sm:$0xff] }
 0x22f   : > { %1007 = vmatprep.subr.mxu0 %v3918_v52  ;;  %3201 = vmatpush3.msra.mxu1 %v3958_v62  ;;  %v4010_v11 = vld [vmem:[%s3684_s14 + $0xd0] sm:$0xff]  ;;  %v4014_v12 = vld [vmem:[%s3684_s14 + $0x48] sm:$0xff]  ;;  %v4023_v14 = vld [vmem:[%s3684_s14 + $0xb8] sm:$0xff] }
 0x230   : > { %1008 = vmatpush1.msra.mxu0 %v3922_v53  ;;  %3202 = vmatprep.subr.mxu1 %v4812_v45  ;;  %v4027_v15 = vld [vmem:[%s3684_s14 + $0x30] sm:$0xff]  ;;  %v4032_v16 = vld [vmem:[%s3684_s14 + $0x20] sm:$0xff]  ;;  %v4040_v18 = vld [vmem:[%s3684_s14 + $0x18] sm:$0xff] }
 0x231   : > { %1009 = vmatprep.subr.mxu0 %v3926_v54  ;;  %3203 = vmatpush3.msra.mxu1 %v3971_v3  ;;  %v4036_v17 = vld [vmem:[%s3684_s14 + $0xa0] sm:$0xff]  ;;  %4833 = vst [vmem:[#allocation5_spill] sm:$0xff] %v4040_v18  ;;  %v4045_v19 = vld [vmem:[%s3684_s14 + $0x8] sm:$0xff]  ;;  %v4059_v22 = vld [vmem:[%s3684_s14 + $0x70] sm:$0xff] }
 0x232   : > { %1010 = vmatpush1.msra.mxu0 %v3933_v56  ;;  %3204 = vmatprep.subr.mxu1 %v4812_v45  ;;  %4834 = vst [vmem:[#allocation6_spill] sm:$0xff] %v4045_v19  ;;  %v4049_v20 = vld [vmem:[%s3684_s14 + $0x88] sm:$0xff]  ;;  %v4053_v21 = vld [vmem:[%s3684_s14] sm:$0xff]  ;;  %v4066_v23 = vld [vmem:[%s3684_s14 + $0x58] sm:$0xff] }
 0x233   : > { %1011 = vmatprep.subr.mxu0 %v3941_v59  ;;  %3205 = vmatpush3.msra.mxu1 %v3984_v7  ;;  %4835 = vst [vmem:[#allocation7_spill] sm:$0xff] %v4053_v21  ;;  %v4072_v24 = vld [vmem:[%s3684_s14 + $0x40] sm:$0xff]  ;;  %v4079_v25 = vld [vmem:[%s3684_s14 + $0x28] sm:$0xff]  ;;  %v4086_v26 = vld [vmem:[%s3684_s14 + $0x10] sm:$0xff] }
 0x234   : > { %1012 = vmatpush1.msra.mxu0 %v3949_v60  ;;  %3206 = vmatprep.subr.mxu1 %v4812_v45  ;;  %4836 = vst [vmem:[#allocation8_spill] sm:$0xff] %v4079_v25  ;;  %4837 = vst [vmem:[#allocation9_spill] sm:$0xff] %v4086_v26  ;;  %v962_v27 = vld [vmem:[#allocation2 + $0xb0] sm:$0xff]  ;;  %v963_v31 = vld [vmem:[#allocation2] sm:$0xff] }
 0x235   : > { %1013 = vmatprep.subr.mxu0 %v3954_v61  ;;  %3207 = vmatpush3.msra.mxu1 %v3997_v6 }
 0x236   : > { %1014 = vmatpush1.msra.mxu0 %v3962_v63  ;;  %3208 = vmatprep.subr.mxu1 %v4812_v45 }
 0x237   : > { %1015 = vmatprep.subr.mxu0 %v3967_v2  ;;  %3209 = vmatpush3.msra.mxu1 %v4010_v11 }
 0x238   : > { %1016 = vmatpush1.msra.mxu0 %v3975_v4  ;;  %3210 = vmatprep.subr.mxu1 %v4812_v45 }
 0x239   : > { %1017 = vmatprep.subr.mxu0 %v3980_v5  ;;  %3211 = vmatpush3.msra.mxu1 %v4023_v14 }
 0x23a   : > { %1018 = vmatpush1.msra.mxu0 %v3988_v1  ;;  %3212 = vmatprep.subr.mxu1 %v4812_v45 }
 0x23b   : > { %1019 = vmatprep.subr.mxu0 %v3993_v8  ;;  %3213 = vmatpush3.msra.mxu1 %v4036_v17 }
 0x23c   : > { %1020 = vmatpush1.msra.mxu0 %v4001_v9  ;;  %3214 = vmatprep.subr.mxu1 %v4812_v45 }
 0x23d   : > { %1021 = vmatprep.subr.mxu0 %v4006_v10  ;;  %3215 = vmatpush3.msra.mxu1 %v4049_v20 }
 0x23e   : > { %1022 = vmatpush1.msra.mxu0 %v4014_v12  ;;  %3216 = vmatprep.subr.mxu1 %v4812_v45 }
 0x23f   : > { %1023 = vmatprep.subr.mxu0 %v4019_v13  ;;  %3217 = vmatpush3.msra.mxu1 %v4059_v22 }
 0x240   : > { %1024 = vmatpush1.msra.mxu0 %v4027_v15  ;;  %3218 = vmatprep.subr.mxu1 %v4812_v45 }
 0x241   : > { %1025 = vmatprep.subr.mxu0 %v4032_v16  ;;  %3219 = vmatpush3.msra.mxu1 %v4066_v23 }
 0x242   : > { %1026 = vmatpush1.msra.mxu0 %v4040_v18  ;;  %3220 = vmatprep.subr.mxu1 %v4812_v45 }
 0x243   : > { %1027 = vmatprep.subr.mxu0 %v4045_v19  ;;  %3221 = vmatpush3.msra.mxu1 %v4072_v24 }
 0x244   : > { %1028 = vmatpush1.msra.mxu0 %v4053_v21  ;;  %3222 = vmatprep.subr.mxu1 %v4812_v45 }
 0x245   : > { %1062 = vmatmul.mubr.f32.vlgmr.msra.gmra.mxu0 %v4812_v45  ;;  %1215 = vmatprep.subr.mxu0 %v3876_v41 }
 0x246   : > { %1216 = vmatpush1.msra.mxu0 %v3879_v42  ;;  %3223 = vmatpush3.msra.mxu1 %v4079_v25 }
 0x247   : > { %1217 = vmatprep.subr.mxu0 %v3882_v43  ;;  %3224 = vmatprep.subr.mxu1 %v4812_v45 }
 0x248   : > { %1218 = vmatpush1.msra.mxu0 %v3886_v44  ;;  %3225 = vmatpush3.msra.mxu1 %v4086_v26 }
 0x249   : > { %1219 = vmatprep.subr.mxu0 %v3891_v46  ;;  %3227 = vmatmul.mubr.f32.vlgmr.msra.gmra.mxu1 %v4812_v45 }
 0x24a   : > { %1220 = vmatpush1.msra.mxu0 %v3896_v47  ;;  %3229 = vmatprep.subr.mxu1 %v4812_v45 }
 0x24b   : > { %1221 = vmatprep.subr.mxu0 %v3902_v48  ;;  %3230 = vmatpush3.msra.mxu1 %v3929_v55 }
 0x24c   : > { %1222 = vmatpush1.msra.mxu0 %v3906_v49  ;;  %3231 = vmatprep.subr.mxu1 %v4812_v45 }
 0x24d   : > { %1223 = vmatprep.subr.mxu0 %v3910_v50  ;;  %3232 = vmatpush3.msra.mxu1 %v3937_v58 }
 0x24e   : > { %1224 = vmatpush1.msra.mxu0 %v3914_v51  ;;  %3233 = vmatprep.subr.mxu1 %v4812_v45 }
 0x24f   : > { %1225 = vmatprep.subr.mxu0 %v3918_v52  ;;  %3234 = vmatpush3.msra.mxu1 %v3945_v57 }
 0x250   : > { %1226 = vmatpush1.msra.mxu0 %v3922_v53  ;;  %3235 = vmatprep.subr.mxu1 %v4812_v45 }
 0x251   : > { %1227 = vmatprep.subr.mxu0 %v3926_v54  ;;  %3236 = vmatpush3.msra.mxu1 %v3958_v62 }
 0x252   : > { %1228 = vmatpush1.msra.mxu0 %v3933_v56  ;;  %3237 = vmatprep.subr.mxu1 %v4812_v45 }
 0x253   : > { %1229 = vmatprep.subr.mxu0 %v3941_v59  ;;  %3238 = vmatpush3.msra.mxu1 %v3971_v3 }
 0x254   : > { %1230 = vmatpush1.msra.mxu0 %v3949_v60  ;;  %3239 = vmatprep.subr.mxu1 %v4812_v45 }
 0x255   : > { %1231 = vmatprep.subr.mxu0 %v3954_v61  ;;  %3240 = vmatpush3.msra.mxu1 %v3984_v7 }
 0x256   : > { %1232 = vmatpush1.msra.mxu0 %v3962_v63  ;;  %3241 = vmatprep.subr.mxu1 %v4812_v45 }
 0x257   : > { %1233 = vmatprep.subr.mxu0 %v3967_v2  ;;  %3242 = vmatpush3.msra.mxu1 %v3997_v6 }
 0x258   : > { %1234 = vmatpush1.msra.mxu0 %v3975_v4  ;;  %3243 = vmatprep.subr.mxu1 %v4812_v45 }
 0x259   : > { %1235 = vmatprep.subr.mxu0 %v3980_v5  ;;  %3244 = vmatpush3.msra.mxu1 %v4010_v11 }
 0x25a   : > { %1236 = vmatpush1.msra.mxu0 %v3988_v1  ;;  %3245 = vmatprep.subr.mxu1 %v4812_v45 }
 0x25b   : > { %1237 = vmatprep.subr.mxu0 %v3993_v8  ;;  %3246 = vmatpush3.msra.mxu1 %v4023_v14 }
 0x25c   : > { %1238 = vmatpush1.msra.mxu0 %v4001_v9  ;;  %3247 = vmatprep.subr.mxu1 %v4812_v45 }
 0x25d   : > { %1239 = vmatprep.subr.mxu0 %v4006_v10  ;;  %3248 = vmatpush3.msra.mxu1 %v4036_v17 }
 0x25e   : > { %1240 = vmatpush1.msra.mxu0 %v4014_v12  ;;  %3249 = vmatprep.subr.mxu1 %v4812_v45 }
 0x25f   : > { %1241 = vmatprep.subr.mxu0 %v4019_v13  ;;  %3250 = vmatpush3.msra.mxu1 %v4049_v20 }
 0x260   : > { %1242 = vmatpush1.msra.mxu0 %v4027_v15  ;;  %3251 = vmatprep.subr.mxu1 %v4812_v45 }
 0x261   : > { %1243 = vmatprep.subr.mxu0 %v4032_v16  ;;  %3252 = vmatpush3.msra.mxu1 %v4059_v22 }
 0x262   : > { %1244 = vmatpush1.msra.mxu0 %v4040_v18  ;;  %3253 = vmatprep.subr.mxu1 %v4812_v45 }
 0x263   : > { %1245 = vmatprep.subr.mxu0 %v4045_v19  ;;  %3254 = vmatpush3.msra.mxu1 %v4066_v23 }
 0x264   : > { %1246 = vmatpush1.msra.mxu0 %v4053_v21  ;;  %1279 = vmatprep.mubr.f32.mxu0 %v4812_v45 }
 0x265   : > { %3255 = vmatprep.subr.mxu1 %v4812_v45  ;;  %3261 = vmatprep.mubr.msk.f32.mxu1 %vm3616_vm0, %v4812_v45 }
 0x266   : > { %3256 = vmatpush3.msra.mxu1 %v4072_v24  ;;  %1433 = vmatprep.subr.mxu0 %v3876_v41 }
 0x267   : > { %3257 = vmatprep.subr.mxu1 %v4812_v45 }
 0x268   : > { %3258 = vmatpush3.msra.mxu1 %v4079_v25 }
 0x269   : > { %3259 = vmatprep.subr.mxu1 %v4812_v45 }
 0x26a   : > { %3260 = vmatpush3.msra.mxu1 %v4086_v26 }
 0x26b   : > { %3264 = vmatprep.subr.mxu1 %v4812_v45  ;;  %v964_v45 = vld [vmem:[#allocation2 + $0x10] sm:$0xff] }
 0x305   : > { %v1063_v28 = vpop.f32.mrf.mxu0 }
 0x306   : > { %v1068_v29 = vadd.f32 %v1063_v28, %v962_v27 }
 0x307   : > { %v1065_v32 = vpop.f32.mrf.mxu0 }
 0x308   : > { %v2885_v30 = vmul.f32 -1.442695, %v1068_v29  ;;  %v1075_v35 = vadd.f32 %v1065_v32, %v963_v31  ;;  %v1180_v32 = vld [vmem:[#allocation2 + $0x48] sm:$0xff] }
 0x309   : > { %v1164_v33 = vpop.f32.mrf.mxu1 }
 0x30a   : > { %3525 = vpow2.f32 %v2885_v30  ;;  %v2886_v36 = vmul.f32 -1.442695, %v1075_v35  ;;  %v1165_v39 = vadd.f32 %v3674_v0, %v1164_v33 }
 0x30b   : > { %v3228_v34 = vpop.f32.mrf.mxu1 }
 0x30c   : > { %3527 = vpow2.f32 %v2886_v36 }
 0x317   : > { %v3526_v37 = vpop.eup %3525 }
 0x318   : > { %v1072_v38 = vadd.f32 1.0, %v3526_v37 }
 0x319   : > { %v3528_v40 = vpop.eup %3527 }
 0x31a   : > { %3529 = vrcp.f32 %v1072_v38  ;;  %v1079_v21 = vadd.f32 1.0, %v3528_v40 }
 0x327   : > { %v3530_v41 = vpop.eup %3529 }
 0x328   : > { %v1168_v26 = vmul.f32 %v3530_v41, %v1165_v39  ;;  %v4838_v41 = vmov 0.0   ;;  %v1181_v39 = vld [vmem:[#allocation2 + $0x60] sm:$0xff] }
 0x32a   : > { %v1169_v27 = vadd.f32 %v1168_v26, %v964_v45  ;;  %v4839_v45 = vld [vmem:[#allocation7_spill] sm:$0xff]  ;;  %v4841_v26 = vld [vmem:[#allocation4_spill] sm:$0xff] }
 0x32c   : > { %3531 = vtanh.f32 %v1169_v27 }
 0x32d   : > { %3533 = vrcp.f32 %v1079_v21  ;;  %v4840_v21 = vld [vmem:[#allocation9_spill] sm:$0xff] }
 0x339   : > { %v3532_v28 = vpop.eup %3531 }
 0x33a   : > { %v1171_v29 = vsub.f32 0.0, %v3532_v28  ;;  %v3534_v30 = vpop.eup %3533 }
 0x33c   : > { %v1172_v34 = vmul.f32 %v3534_v30, %v1171_v29 }
 0x33e   : > { %v4158_v31 = vadd.f32 %v3532_v28, %v1172_v34 }
 0x340   : > { %1176 = vst [vmem:[#allocation3 + $0x30] sm:$0xff] %v4158_v31  ;;  %1280 = vmatmul.mubr.f32.vlgmr.msra.gmra.mxu0 %v4158_v31  ;;  %3262 = vmatmul.mubr.f32.vlgmr.msra.gmra.mxu1 %v4158_v31 }
 0x341   : > { %1434 = vmatpush1.msra.mxu0 %v3879_v42  ;;  %3265 = vmatpush3.msra.mxu1 %v3929_v55 }
 0x342   : > { %1435 = vmatprep.subr.mxu0 %v3882_v43  ;;  %3266 = vmatprep.subr.mxu1 %v4838_v41 }
 0x343   : > { %1436 = vmatpush1.msra.mxu0 %v3886_v44  ;;  %3267 = vmatpush3.msra.mxu1 %v3937_v58 }
 0x344   : > { %1437 = vmatprep.subr.mxu0 %v3891_v46  ;;  %3268 = vmatprep.subr.mxu1 %v4838_v41 }
 0x345   : > { %1438 = vmatpush1.msra.mxu0 %v3896_v47  ;;  %3269 = vmatpush3.msra.mxu1 %v3945_v57 }
 0x346   : > { %1439 = vmatprep.subr.mxu0 %v3902_v48  ;;  %3270 = vmatprep.subr.mxu1 %v4838_v41 }
 0x347   : > { %1440 = vmatpush1.msra.mxu0 %v3906_v49  ;;  %3271 = vmatpush3.msra.mxu1 %v3958_v62 }
 0x348   : > { %1441 = vmatprep.subr.mxu0 %v3910_v50  ;;  %3272 = vmatprep.subr.mxu1 %v4838_v41 }
 0x349   : > { %1442 = vmatpush1.msra.mxu0 %v3914_v51  ;;  %3273 = vmatpush3.msra.mxu1 %v3971_v3 }
 0x34a   : > { %1443 = vmatprep.subr.mxu0 %v3918_v52  ;;  %3274 = vmatprep.subr.mxu1 %v4838_v41 }
 0x34b   : > { %1444 = vmatpush1.msra.mxu0 %v3922_v53  ;;  %3275 = vmatpush3.msra.mxu1 %v3984_v7 }
 0x34c   : > { %1445 = vmatprep.subr.mxu0 %v3926_v54  ;;  %3276 = vmatprep.subr.mxu1 %v4838_v41 }
 0x34d   : > { %1446 = vmatpush1.msra.mxu0 %v3933_v56  ;;  %3277 = vmatpush3.msra.mxu1 %v3997_v6 }
 0x34e   : > { %1447 = vmatprep.subr.mxu0 %v3941_v59  ;;  %3278 = vmatprep.subr.mxu1 %v4838_v41 }
 0x34f   : > { %1448 = vmatpush1.msra.mxu0 %v3949_v60  ;;  %3279 = vmatpush3.msra.mxu1 %v4010_v11 }
 0x350   : > { %1449 = vmatprep.subr.mxu0 %v3954_v61  ;;  %3280 = vmatprep.subr.mxu1 %v4838_v41 }
 0x351   : > { %1450 = vmatpush1.msra.mxu0 %v3962_v63  ;;  %3281 = vmatpush3.msra.mxu1 %v4023_v14 }
 0x352   : > { %1451 = vmatprep.subr.mxu0 %v3967_v2  ;;  %3282 = vmatprep.subr.mxu1 %v4838_v41 }
 0x353   : > { %1452 = vmatpush1.msra.mxu0 %v3975_v4  ;;  %3283 = vmatpush3.msra.mxu1 %v4036_v17 }
 0x354   : > { %1453 = vmatprep.subr.mxu0 %v3980_v5  ;;  %3284 = vmatprep.subr.mxu1 %v4838_v41 }
 0x355   : > { %1454 = vmatpush1.msra.mxu0 %v3988_v1  ;;  %3285 = vmatpush3.msra.mxu1 %v4049_v20 }
 0x356   : > { %1455 = vmatprep.subr.mxu0 %v3993_v8  ;;  %3286 = vmatprep.subr.mxu1 %v4838_v41 }
 0x357   : > { %1456 = vmatpush1.msra.mxu0 %v4001_v9  ;;  %3287 = vmatpush3.msra.mxu1 %v4059_v22 }
 0x358   : > { %1457 = vmatprep.subr.mxu0 %v4006_v10  ;;  %3288 = vmatprep.subr.mxu1 %v4838_v41 }
 0x359   : > { %1458 = vmatpush1.msra.mxu0 %v4014_v12  ;;  %3289 = vmatpush3.msra.mxu1 %v4066_v23 }
 0x35a   : > { %1459 = vmatprep.subr.mxu0 %v4019_v13  ;;  %3290 = vmatprep.subr.mxu1 %v4838_v41 }
 0x35b   : > { %1460 = vmatpush1.msra.mxu0 %v4027_v15  ;;  %3291 = vmatpush3.msra.mxu1 %v4072_v24 }
 0x35c   : > { %1461 = vmatprep.subr.mxu0 %v4032_v16  ;;  %3292 = vmatprep.subr.mxu1 %v4838_v41 }
 0x35d   : > { %1462 = vmatpush1.msra.mxu0 %v4040_v18  ;;  %3293 = vmatpush3.msra.mxu1 %v4079_v25 }
 0x35e   : > { %1463 = vmatprep.subr.mxu0 %v4045_v19  ;;  %3294 = vmatprep.subr.mxu1 %v4838_v41 }
 0x35f   : > { %1464 = vmatpush1.msra.mxu0 %v4839_v45  ;;  %1497 = vmatprep.mubr.f32.mxu0 %v4838_v41  ;;  %v1182_v45 = vld [vmem:[#allocation2 + $0x28] sm:$0xff] }
 0x360   : > { %3295 = vmatpush3.msra.mxu1 %v4840_v21  ;;  %3296 = vmatprep.mubr.msk.f32.mxu1 %vm3616_vm0, %v4838_v41 }
 0x361   : > { %1651 = vmatprep.subr.mxu0 %v4841_v26  ;;  %3299 = vmatprep.subr.mxu1 %v4838_v41 }
 0x400   : > { %v1281_v33 = vpop.f32.mrf.mxu0  ;;  %v1382_v35 = vpop.f32.mrf.mxu1 }
 0x401   : > { %v1286_v36 = vadd.f32 %v1281_v33, %v1180_v32  ;;  %v1383_v26 = vadd.f32 %v3674_v0, %v1382_v35  ;;  %v4398_v35 = vld [vmem:[%s3684_s14 + $0xd0] sm:$0xff] }
 0x402   : > { %v3263_v37 = vpop.f32.mrf.mxu1  ;;  %v1283_v40 = vpop.f32.mrf.mxu0 }
 0x403   : > { %v2887_v38 = vmul.f32 -1.442695, %v1286_v36  ;;  %v1293_v27 = vadd.f32 %v1283_v40, %v1181_v39  ;;  %v4401_v39 = vld [vmem:[%s3684_s14 + $0xb0] sm:$0xff]  ;;  %v4406_v40 = vld [vmem:[%s3684_s14 + $0xa8] sm:$0xff] }
 0x405   : > { %3535 = vpow2.f32 %v2887_v38  ;;  %v2888_v28 = vmul.f32 -1.442695, %v1293_v27  ;;  %v4409_v27 = vld [vmem:[%s3684_s14 + $0xb8] sm:$0xff] }
 0x407   : > { %3537 = vpow2.f32 %v2888_v28  ;;  %v4414_v28 = vld [vmem:[%s3684_s14 + $0x98] sm:$0xff] }
 0x412   : > { %v3536_v29 = vpop.eup %3535 }
 0x413   : > { %v1290_v30 = vadd.f32 1.0, %v3536_v29  ;;  %v4419_v29 = vld [vmem:[%s3684_s14 + $0x90] sm:$0xff] }
 0x414   : > { %v3538_v34 = vpop.eup %3537 }
 0x415   : > { %3539 = vrcp.f32 %v1290_v30  ;;  %v1297_v18 = vadd.f32 1.0, %v3538_v34  ;;  %v4422_v30 = vld [vmem:[%s3684_s14 + $0xa0] sm:$0xff] }
 0x416   : > { %v4427_v34 = vld [vmem:[%s3684_s14 + $0x80] sm:$0xff] }
 0x422   : > { %v3540_v21 = vpop.eup %3539 }
 0x423   : > { %v1386_v19 = vmul.f32 %v3540_v21, %v1383_v26  ;;  %v4395_v21 = vld [vmem:[%s3684_s14 + $0xc0] sm:$0xff]  ;;  %v4432_v26 = vld [vmem:[%s3684_s14 + $0x78] sm:$0xff] }
 0x425   : > { %v1387_v25 = vadd.f32 %v1386_v19, %v1182_v45  ;;  %v4361_v19 = vld [vmem:[%s3684_s14 + $0x118] sm:$0xff]  ;;  %v4390_v45 = vld [vmem:[%s3684_s14 + $0xc8] sm:$0xff] }
 0x427   : > { %3541 = vtanh.f32 %v1387_v25  ;;  %v4384_v25 = vld [vmem:[%s3684_s14 + $0xd8] sm:$0xff] }
 0x428   : > { %3543 = vrcp.f32 %v1297_v18  ;;  %v4358_v18 = vld [vmem:[%s3684_s14 + $0x108] sm:$0xff] }
 0x434   : > { %v3542_v32 = vpop.eup %3541 }
 0x435   : > { %v1389_v33 = vsub.f32 %v4158_v31, %v3542_v32  ;;  %v3544_v36 = vpop.eup %3543  ;;  %v4387_v31 = vld [vmem:[%s3684_s14 + $0xe8] sm:$0xff] }
 0x437   : > { %v1390_v37 = vmul.f32 %v3544_v36, %v1389_v33  ;;  %v4440_v33 = vld [vmem:[%s3684_s14 + $0x68] sm:$0xff]  ;;  %v4445_v36 = vld [vmem:[%s3684_s14 + $0x60] sm:$0xff] }
 0x439   : > { %v4232_v38 = vadd.f32 %v3542_v32, %v1390_v37  ;;  %v4435_v32 = vld [vmem:[%s3684_s14 + $0x88] sm:$0xff]  ;;  %v4448_v37 = vld [vmem:[%s3684_s14 + $0x70] sm:$0xff] }
 0x43b   : > { %1394 = vst [vmem:[#allocation3 + $0x8] sm:$0xff] %v4232_v38  ;;  %1498 = vmatmul.mubr.f32.vlgmr.msra.gmra.mxu0 %v4232_v38  ;;  %3297 = vmatmul.mubr.f32.vlgmr.msra.gmra.mxu1 %v4232_v38 }
 0x43c   : > { %1652 = vmatpush1.msra.mxu0 %v3879_v42  ;;  %3300 = vmatpush3.msra.mxu1 %v3929_v55  ;;  %v4842_v42 = vld [vmem:[#allocation5_spill] sm:$0xff] }
 0x43d   : > { %1653 = vmatprep.subr.mxu0 %v3882_v43  ;;  %3301 = vmatprep.subr.mxu1 %v4838_v41  ;;  %v4843_v43 = vld [vmem:[#allocation8_spill] sm:$0xff] }
 0x43e   : > { %1654 = vmatpush1.msra.mxu0 %v3886_v44  ;;  %3302 = vmatpush3.msra.mxu1 %v3937_v58  ;;  %v4844_v44 = vld [vmem:[#allocation6_spill] sm:$0xff] }
 0x43f   : > { %1655 = vmatprep.subr.mxu0 %v3891_v46  ;;  %3303 = vmatprep.subr.mxu1 %v4838_v41  ;;  %v4845_v46 = vld [vmem:[#allocation7_spill] sm:$0xff] }
 0x440   : > { %1656 = vmatpush1.msra.mxu0 %v3896_v47  ;;  %3304 = vmatpush3.msra.mxu1 %v3945_v57  ;;  %v4846_v47 = vld [vmem:[#allocation9_spill] sm:$0xff] }
 0x441   : > { %1657 = vmatprep.subr.mxu0 %v3902_v48  ;;  %3305 = vmatprep.subr.mxu1 %v4838_v41  ;;  %v1398_v48 = vld [vmem:[#allocation2 + $0x40] sm:$0xff] }
 0x442   : > { %1658 = vmatpush1.msra.mxu0 %v3906_v49  ;;  %3306 = vmatpush3.msra.mxu1 %v3958_v62 }
 0x443   : > { %1659 = vmatprep.subr.mxu0 %v3910_v50  ;;  %3307 = vmatprep.subr.mxu1 %v4838_v41 }
 0x444   : > { %1660 = vmatpush1.msra.mxu0 %v3914_v51  ;;  %3308 = vmatpush3.msra.mxu1 %v3971_v3 }
 0x445   : > { %1661 = vmatprep.subr.mxu0 %v3918_v52  ;;  %3309 = vmatprep.subr.mxu1 %v4838_v41 }
 0x446   : > { %1662 = vmatpush1.msra.mxu0 %v3922_v53  ;;  %3310 = vmatpush3.msra.mxu1 %v3984_v7 }
 0x447   : > { %1663 = vmatprep.subr.mxu0 %v3926_v54  ;;  %3311 = vmatprep.subr.mxu1 %v4838_v41  ;;  %v1399_v54 = vld [vmem:[#allocation2 + $0x78] sm:$0xff] }
 0x448   : > { %1664 = vmatpush1.msra.mxu0 %v3933_v56  ;;  %3312 = vmatpush3.msra.mxu1 %v3997_v6 }
 0x449   : > { %1665 = vmatprep.subr.mxu0 %v3941_v59  ;;  %3313 = vmatprep.subr.mxu1 %v4838_v41 }
 0x44a   : > { %1666 = vmatpush1.msra.mxu0 %v3949_v60  ;;  %3314 = vmatpush3.msra.mxu1 %v4010_v11 }
 0x44b   : > { %1667 = vmatprep.subr.mxu0 %v3954_v61  ;;  %3315 = vmatprep.subr.mxu1 %v4838_v41 }
 0x44c   : > { %1668 = vmatpush1.msra.mxu0 %v3962_v63  ;;  %3316 = vmatpush3.msra.mxu1 %v4023_v14  ;;  %v4342_v14 = vld [vmem:[%s3684_s14 + $0x138] sm:$0xff] }
 0x44d   : > { %1669 = vmatprep.subr.mxu0 %v3967_v2  ;;  %3317 = vmatprep.subr.mxu1 %v4838_v41 }
 0x44e   : > { %1670 = vmatpush1.msra.mxu0 %v3975_v4  ;;  %3318 = vmatpush3.msra.mxu1 %v4036_v17  ;;  %v4354_v17 = vld [vmem:[%s3684_s14 + $0x110] sm:$0xff] }
 0x44f   : > { %1671 = vmatprep.subr.mxu0 %v3980_v5  ;;  %3319 = vmatprep.subr.mxu1 %v4838_v41  ;;  %v1400_v5 = vld [vmem:[#allocation2 + $0x88] sm:$0xff] }
 0x450   : > { %1672 = vmatpush1.msra.mxu0 %v3988_v1  ;;  %3320 = vmatpush3.msra.mxu1 %v4049_v20  ;;  %v4366_v20 = vld [vmem:[%s3684_s14 + $0xf8] sm:$0xff] }
 0x451   : > { %1673 = vmatprep.subr.mxu0 %v3993_v8  ;;  %3321 = vmatprep.subr.mxu1 %v4838_v41 }
 0x452   : > { %1674 = vmatpush1.msra.mxu0 %v4001_v9  ;;  %3322 = vmatpush3.msra.mxu1 %v4059_v22  ;;  %v4371_v22 = vld [vmem:[%s3684_s14 + $0xf0] sm:$0xff] }
 0x453   : > { %1675 = vmatprep.subr.mxu0 %v4006_v10  ;;  %3323 = vmatprep.subr.mxu1 %v4838_v41 }
 0x454   : > { %1676 = vmatpush1.msra.mxu0 %v4014_v12  ;;  %3324 = vmatpush3.msra.mxu1 %v4066_v23  ;;  %v4374_v23 = vld [vmem:[%s3684_s14 + $0x100] sm:$0xff] }
 0x455   : > { %1677 = vmatprep.subr.mxu0 %v4019_v13  ;;  %3325 = vmatprep.subr.mxu1 %v4838_v41  ;;  %v4326_v13 = vld [vmem:[%s3684_s14 + $0x168] sm:$0xff] }
 0x456   : > { %1678 = vmatpush1.msra.mxu0 %v4027_v15  ;;  %3326 = vmatpush3.msra.mxu1 %v4072_v24  ;;  %v4346_v15 = vld [vmem:[%s3684_s14 + $0x128] sm:$0xff]  ;;  %v4379_v24 = vld [vmem:[%s3684_s14 + $0xe0] sm:$0xff] }
 0x457   : > { %1679 = vmatprep.subr.mxu0 %v4032_v16  ;;  %3327 = vmatprep.subr.mxu1 %v4838_v41  ;;  %v4350_v16 = vld [vmem:[%s3684_s14 + $0x120] sm:$0xff] }
 0x458   : > { %1680 = vmatpush1.msra.mxu0 %v4842_v42  ;;  %3328 = vmatpush3.msra.mxu1 %v4843_v43  ;;  %v4458_v42 = vld [vmem:[%s3684_s14 + $0x48] sm:$0xff]  ;;  %v4461_v43 = vld [vmem:[%s3684_s14 + $0x58] sm:$0xff] }
 0x459   : > { %1681 = vmatprep.subr.mxu0 %v4844_v44  ;;  %3329 = vmatprep.subr.mxu1 %v4838_v41  ;;  %v4466_v44 = vld [vmem:[%s3684_s14 + $0x38] sm:$0xff] }
 0x45a   : > { %1682 = vmatpush1.msra.mxu0 %v4845_v46  ;;  %1715 = vmatprep.mubr.f32.mxu0 %v4838_v41  ;;  %v4471_v46 = vld [vmem:[%s3684_s14 + $0x30] sm:$0xff] }
 0x45b   : > { %3330 = vmatpush3.msra.mxu1 %v4846_v47  ;;  %3331 = vmatprep.mubr.msk.f32.mxu1 %vm3616_vm0, %v4838_v41  ;;  %v4474_v47 = vld [vmem:[%s3684_s14 + $0x40] sm:$0xff] }
 0x45c   : > { %3334 = vmatprep.subr.mxu1 %v4838_v41 }
 0x4fb   : > { %v1499_v49 = vpop.f32.mrf.mxu0  ;;  %v1600_v50 = vpop.f32.mrf.mxu1 }
 0x4fc   : > { %v1504_v51 = vadd.f32 %v1499_v49, %v1398_v48  ;;  %v1601_v3 = vadd.f32 %v3674_v0, %v1600_v50  ;;  %v4479_v48 = vld [vmem:[%s3684_s14 + $0x20] sm:$0xff]  ;;  %v4484_v49 = vld [vmem:[%s3684_s14 + $0x18] sm:$0xff]  ;;  %v4487_v50 = vld [vmem:[%s3684_s14 + $0x28] sm:$0xff] }
 0x4fd   : > { %v3298_v52 = vpop.f32.mrf.mxu1  ;;  %v1501_v56 = vpop.f32.mrf.mxu0  ;;  %4848 = vst [vmem:[#allocation5_spill] sm:$0xff] %v4484_v49  ;;  %4849 = vst [vmem:[#allocation8_spill] sm:$0xff] %v4487_v50 }
 0x4fe   : > { %v2889_v53 = vmul.f32 -1.442695, %v1504_v51  ;;  %v1511_v59 = vadd.f32 %v1501_v56, %v1399_v54  ;;  %v4492_v51 = vld [vmem:[%s3684_s14 + $0x8] sm:$0xff]  ;;  %v4497_v52 = vld [vmem:[%s3684_s14] sm:$0xff]  ;;  %v1616_v54 = vld [vmem:[#allocation2 + $0x90] sm:$0xff] }
 0x4ff   : > { %4850 = vst [vmem:[#allocation6_spill] sm:$0xff] %v4492_v51  ;;  %4851 = vst [vmem:[#allocation7_spill] sm:$0xff] %v4497_v52 }
 0x500   : > { %3545 = vpow2.f32 %v2889_v53  ;;  %v2890_v60 = vmul.f32 -1.442695, %v1511_v59  ;;  %v4500_v53 = vld [vmem:[%s3684_s14 + $0x10] sm:$0xff] }
 0x501   : > { %4852 = vst [vmem:[#allocation9_spill] sm:$0xff] %v4500_v53 }
 0x502   : > { %3547 = vpow2.f32 %v2890_v60 }
 0x50d   : > { %v3546_v61 = vpop.eup %3545 }
 0x50e   : > { %v1508_v63 = vadd.f32 1.0, %v3546_v61 }
 0x50f   : > { %v3548_v2 = vpop.eup %3547 }
 0x510   : > { %3549 = vrcp.f32 %v1508_v63  ;;  %v1515_v8 = vadd.f32 1.0, %v3548_v2  ;;  %v1617_v2 = vld [vmem:[#allocation2 + $0x18] sm:$0xff] }
 0x51d   : > { %v3550_v4 = vpop.eup %3549 }
 0x51e   : > { %v1604_v7 = vmul.f32 %v3550_v4, %v1601_v3 }
 0x520   : > { %v1605_v1 = vadd.f32 %v1604_v7, %v1400_v5 }
 0x522   : > { %3551 = vtanh.f32 %v1605_v1 }
 0x523   : > { %3553 = vrcp.f32 %v1515_v8 }
 0x52f   : > { %v3552_v6 = vpop.eup %3551 }
 0x530   : > { %v1607_v9 = vsub.f32 %v4232_v38, %v3552_v6  ;;  %v3554_v10 = vpop.eup %3553  ;;  %v4453_v38 = vld [vmem:[%s3684_s14 + $0x50] sm:$0xff] }
 0x532   : > { %v1608_v11 = vmul.f32 %v3554_v10, %v1607_v9  ;;  %v1618_v10 = vld [vmem:[#allocation2 + $0x98] sm:$0xff] }
 0x534   : > { %v4305_v12 = vadd.f32 %v3552_v6, %v1608_v11 }
 0x536   : > { %1612 = vst [vmem:[#allocation3 + $0x20] sm:$0xff] %v4305_v12  ;;  %1716 = vmatmul.mubr.f32.vlgmr.msra.gmra.mxu0 %v4305_v12  ;;  %3332 = vmatmul.mubr.f32.vlgmr.msra.gmra.mxu1 %v4305_v12 }
 0x537   : > { %3335 = vmatpush3.msra.mxu1 %v3929_v55  ;;  %1933 = vmatprep.mubr.f32.mxu0 %v4838_v41  ;;  %v4322_v55 = vld [vmem:[%s3684_s14 + $0x170] sm:$0xff] }
 0x538   : > { %3336 = vmatprep.subr.mxu1 %v4838_v41  ;;  %3366 = vmatprep.mubr.msk.f32.mxu1 %vm3616_vm0, %v4838_v41  ;;  %4847 = vst [vmem:[#allocation4_spill] sm:$0xff] %v4322_v55 }
 0x539   : > { %3337 = vmatpush3.msra.mxu1 %v3937_v58  ;;  %1869 = vmatprep.subr.mxu0 %v4322_v55  ;;  %v4330_v58 = vld [vmem:[%s3684_s14 + $0x158] sm:$0xff] }
 0x53a   : > { %3338 = vmatprep.subr.mxu1 %v4838_v41  ;;  %1870 = vmatpush1.msra.mxu0 %v4326_v13 }
 0x53b   : > { %3339 = vmatpush3.msra.mxu1 %v3945_v57  ;;  %1871 = vmatprep.subr.mxu0 %v4330_v58  ;;  %v4334_v57 = vld [vmem:[%s3684_s14 + $0x150] sm:$0xff] }
 0x53c   : > { %3340 = vmatprep.subr.mxu1 %v4838_v41  ;;  %1872 = vmatpush1.msra.mxu0 %v4334_v57 }
 0x53d   : > { %3341 = vmatpush3.msra.mxu1 %v3958_v62  ;;  %v4338_v62 = vld [vmem:[%s3684_s14 + $0x140] sm:$0xff] }
 0x53e   : > { %3342 = vmatprep.subr.mxu1 %v4838_v41  ;;  %1873 = vmatprep.subr.mxu0 %v4338_v62 }
 0x53f   : > { %1874 = vmatpush1.msra.mxu0 %v4342_v14  ;;  %3343 = vmatpush3.msra.mxu1 %v4361_v19 }
 0x540   : > { %1875 = vmatprep.subr.mxu0 %v4346_v15  ;;  %3344 = vmatprep.subr.mxu1 %v4838_v41 }
 0x541   : > { %1876 = vmatpush1.msra.mxu0 %v4350_v16  ;;  %3345 = vmatpush3.msra.mxu1 %v4374_v23 }
 0x542   : > { %1877 = vmatprep.subr.mxu0 %v4354_v17  ;;  %3346 = vmatprep.subr.mxu1 %v4838_v41 }
 0x543   : > { %1878 = vmatpush1.msra.mxu0 %v4358_v18  ;;  %3347 = vmatpush3.msra.mxu1 %v4387_v31 }
 0x544   : > { %1879 = vmatprep.subr.mxu0 %v4366_v20  ;;  %3348 = vmatprep.subr.mxu1 %v4838_v41 }
 0x545   : > { %1880 = vmatpush1.msra.mxu0 %v4371_v22  ;;  %3349 = vmatpush3.msra.mxu1 %v4398_v35 }
 0x546   : > { %1881 = vmatprep.subr.mxu0 %v4379_v24  ;;  %3350 = vmatprep.subr.mxu1 %v4838_v41 }
 0x547   : > { %1882 = vmatpush1.msra.mxu0 %v4384_v25  ;;  %3351 = vmatpush3.msra.mxu1 %v4409_v27 }
 0x548   : > { %1883 = vmatprep.subr.mxu0 %v4390_v45  ;;  %3352 = vmatprep.subr.mxu1 %v4838_v41 }
 0x549   : > { %1884 = vmatpush1.msra.mxu0 %v4395_v21  ;;  %3353 = vmatpush3.msra.mxu1 %v4422_v30 }
 0x54a   : > { %1885 = vmatprep.subr.mxu0 %v4401_v39  ;;  %3354 = vmatprep.subr.mxu1 %v4838_v41 }
 0x54b   : > { %1886 = vmatpush1.msra.mxu0 %v4406_v40  ;;  %3355 = vmatpush3.msra.mxu1 %v4435_v32 }
 0x54c   : > { %1887 = vmatprep.subr.mxu0 %v4414_v28  ;;  %3356 = vmatprep.subr.mxu1 %v4838_v41 }
 0x54d   : > { %1888 = vmatpush1.msra.mxu0 %v4419_v29  ;;  %3357 = vmatpush3.msra.mxu1 %v4448_v37 }
 0x54e   : > { %1889 = vmatprep.subr.mxu0 %v4427_v34  ;;  %3358 = vmatprep.subr.mxu1 %v4838_v41 }
 0x54f   : > { %1890 = vmatpush1.msra.mxu0 %v4432_v26  ;;  %3359 = vmatpush3.msra.mxu1 %v4461_v43 }
 0x550   : > { %1891 = vmatprep.subr.mxu0 %v4440_v33  ;;  %3360 = vmatprep.subr.mxu1 %v4838_v41 }
 0x551   : > { %1892 = vmatpush1.msra.mxu0 %v4445_v36  ;;  %3361 = vmatpush3.msra.mxu1 %v4474_v47 }
 0x552   : > { %1893 = vmatprep.subr.mxu0 %v4453_v38  ;;  %3362 = vmatprep.subr.mxu1 %v4838_v41 }
 0x553   : > { %1894 = vmatpush1.msra.mxu0 %v4458_v42  ;;  %3363 = vmatpush3.msra.mxu1 %v4487_v50 }
 0x554   : > { %1895 = vmatprep.subr.mxu0 %v4466_v44  ;;  %3364 = vmatprep.subr.mxu1 %v4838_v41 }
 0x555   : > { %1896 = vmatpush1.msra.mxu0 %v4471_v46  ;;  %3365 = vmatpush3.msra.mxu1 %v4500_v53 }
 0x556   : > { %1897 = vmatprep.subr.mxu0 %v4479_v48  ;;  %3369 = vmatprep.subr.mxu1 %v4838_v41 }
 0x557   : > { %1898 = vmatpush1.msra.mxu0 %v4484_v49 }
 0x558   : > { %1899 = vmatprep.subr.mxu0 %v4492_v51 }
 0x559   : > { %1900 = vmatpush1.msra.mxu0 %v4497_v52 }
 0x55a   : > { %2087 = vmatprep.subr.mxu0 %v4322_v55 }
 0x5f6   : > { %v1717_v56 = vpop.f32.mrf.mxu0  ;;  %v1818_v59 = vpop.f32.mrf.mxu1 }
 0x5f7   : > { %v1722_v60 = vadd.f32 %v1717_v56, %v1616_v54  ;;  %v1819_v6 = vadd.f32 %v3674_v0, %v1818_v59  ;;  %v4568_v59 = vld [vmem:[%s3684_s14 + $0x130] sm:$0xff] }
 0x5f8   : > { %v3333_v61 = vpop.f32.mrf.mxu1  ;;  %v1719_v3 = vpop.f32.mrf.mxu0 }
 0x5f9   : > { %v2891_v63 = vmul.f32 -1.442695, %v1722_v60  ;;  %v1729_v4 = vadd.f32 %v1719_v3, %v1617_v2  ;;  %v4853_v2 = vld [vmem:[#allocation8_spill] sm:$0xff]  ;;  %v4854_v3 = vld [vmem:[#allocation9_spill] sm:$0xff] }
 0x5fb   : > { %3555 = vpow2.f32 %v2891_v63  ;;  %v2892_v5 = vmul.f32 -1.442695, %v1729_v4  ;;  %v1834_v4 = vld [vmem:[#allocation2 + $0x38] sm:$0xff] }
 0x5fd   : > { %3557 = vpow2.f32 %v2892_v5 }
 0x608   : > { %v3556_v7 = vpop.eup %3555 }
 0x609   : > { %v1726_v1 = vadd.f32 1.0, %v3556_v7 }
 0x60a   : > { %v3558_v8 = vpop.eup %3557 }
 0x60b   : > { %3559 = vrcp.f32 %v1726_v1  ;;  %v1733_v50 = vadd.f32 1.0, %v3558_v8 }
 0x618   : > { %v3560_v9 = vpop.eup %3559 }
 0x619   : > { %v1822_v11 = vmul.f32 %v3560_v9, %v1819_v6  ;;  %v1835_v9 = vld [vmem:[#allocation2 + $0x50] sm:$0xff] }
 0x61b   : > { %v1823_v53 = vadd.f32 %v1822_v11, %v1618_v10 }
 0x61d   : > { %3561 = vtanh.f32 %v1823_v53  ;;  %v4563_v53 = vld [vmem:[%s3684_s14 + $0x148] sm:$0xff] }
 0x61e   : > { %3563 = vrcp.f32 %v1733_v50  ;;  %v4558_v50 = vld [vmem:[%s3684_s14 + $0x160] sm:$0xff] }
 0x62a   : > { %v3562_v54 = vpop.eup %3561 }
 0x62b   : > { %v1825_v56 = vsub.f32 %v4305_v12, %v3562_v54  ;;  %v3564_v60 = vpop.eup %3563  ;;  %v4553_v12 = vld [vmem:[%s3684_s14 + $0x178] sm:$0xff] }
 0x62d   : > { %v1826_v61 = vmul.f32 %v3564_v60, %v1825_v56 }
 0x62f   : > { %v4512_v63 = vadd.f32 %v3562_v54, %v1826_v61 }
 0x631   : > { %1830 = vst [vmem:[#allocation3] sm:$0xff] %v4512_v63  ;;  %1934 = vmatmul.mubr.f32.vlgmr.msra.gmra.mxu0 %v4512_v63  ;;  %3367 = vmatmul.mubr.f32.vlgmr.msra.gmra.mxu1 %v4512_v63 }
 0x632   : > { %2088 = vmatpush1.msra.mxu0 %v4326_v13  ;;  %2151 = vmatprep.mubr.f32.mxu0 %v4838_v41 }
 0x633   : > { %2089 = vmatprep.subr.mxu0 %v4330_v58  ;;  %3401 = vmatprep.mubr.msk.f32.mxu1 %vm3616_vm0, %v4838_v41 }
 0x634   : > { %2090 = vmatpush1.msra.mxu0 %v4334_v57  ;;  %3370 = vmatpush3.msra.mxu1 %v4553_v12 }
 0x635   : > { %2091 = vmatprep.subr.mxu0 %v4338_v62  ;;  %3371 = vmatprep.subr.mxu1 %v4838_v41 }
 0x636   : > { %2092 = vmatpush1.msra.mxu0 %v4342_v14  ;;  %3372 = vmatpush3.msra.mxu1 %v4558_v50 }
 0x637   : > { %2093 = vmatprep.subr.mxu0 %v4346_v15  ;;  %3373 = vmatprep.subr.mxu1 %v4838_v41 }
 0x638   : > { %2094 = vmatpush1.msra.mxu0 %v4350_v16  ;;  %3374 = vmatpush3.msra.mxu1 %v4563_v53 }
 0x639   : > { %2095 = vmatprep.subr.mxu0 %v4354_v17  ;;  %3375 = vmatprep.subr.mxu1 %v4838_v41 }
 0x63a   : > { %2096 = vmatpush1.msra.mxu0 %v4358_v18  ;;  %3376 = vmatpush3.msra.mxu1 %v4568_v59 }
 0x63b   : > { %2097 = vmatprep.subr.mxu0 %v4366_v20  ;;  %3377 = vmatprep.subr.mxu1 %v4838_v41 }
 0x63c   : > { %2098 = vmatpush1.msra.mxu0 %v4371_v22  ;;  %3378 = vmatpush3.msra.mxu1 %v4361_v19 }
 0x63d   : > { %2099 = vmatprep.subr.mxu0 %v4379_v24  ;;  %3379 = vmatprep.subr.mxu1 %v4838_v41 }
 0x63e   : > { %2100 = vmatpush1.msra.mxu0 %v4384_v25  ;;  %3380 = vmatpush3.msra.mxu1 %v4374_v23 }
 0x63f   : > { %2101 = vmatprep.subr.mxu0 %v4390_v45  ;;  %3381 = vmatprep.subr.mxu1 %v4838_v41 }
 0x640   : > { %2102 = vmatpush1.msra.mxu0 %v4395_v21  ;;  %3382 = vmatpush3.msra.mxu1 %v4387_v31 }
 0x641   : > { %2103 = vmatprep.subr.mxu0 %v4401_v39  ;;  %3383 = vmatprep.subr.mxu1 %v4838_v41 }
 0x642   : > { %2104 = vmatpush1.msra.mxu0 %v4406_v40  ;;  %3384 = vmatpush3.msra.mxu1 %v4398_v35 }
 0x643   : > { %2105 = vmatprep.subr.mxu0 %v4414_v28  ;;  %3385 = vmatprep.subr.mxu1 %v4838_v41 }
 0x644   : > { %2106 = vmatpush1.msra.mxu0 %v4419_v29  ;;  %3386 = vmatpush3.msra.mxu1 %v4409_v27 }
 0x645   : > { %2107 = vmatprep.subr.mxu0 %v4427_v34  ;;  %3387 = vmatprep.subr.mxu1 %v4838_v41 }
 0x646   : > { %2108 = vmatpush1.msra.mxu0 %v4432_v26  ;;  %3388 = vmatpush3.msra.mxu1 %v4422_v30 }
 0x647   : > { %2109 = vmatprep.subr.mxu0 %v4440_v33  ;;  %3389 = vmatprep.subr.mxu1 %v4838_v41 }
 0x648   : > { %2110 = vmatpush1.msra.mxu0 %v4445_v36  ;;  %3390 = vmatpush3.msra.mxu1 %v4435_v32 }
 0x649   : > { %2111 = vmatprep.subr.mxu0 %v4453_v38  ;;  %3391 = vmatprep.subr.mxu1 %v4838_v41 }
 0x64a   : > { %2112 = vmatpush1.msra.mxu0 %v4458_v42  ;;  %3392 = vmatpush3.msra.mxu1 %v4448_v37 }
 0x64b   : > { %2113 = vmatprep.subr.mxu0 %v4466_v44  ;;  %3393 = vmatprep.subr.mxu1 %v4838_v41 }
 0x64c   : > { %2114 = vmatpush1.msra.mxu0 %v4471_v46  ;;  %3394 = vmatpush3.msra.mxu1 %v4461_v43 }
 0x64d   : > { %2115 = vmatprep.subr.mxu0 %v4479_v48  ;;  %3395 = vmatprep.subr.mxu1 %v4838_v41 }
 0x64e   : > { %2116 = vmatpush1.msra.mxu0 %v4484_v49  ;;  %3396 = vmatpush3.msra.mxu1 %v4474_v47 }
 0x64f   : > { %2117 = vmatprep.subr.mxu0 %v4492_v51  ;;  %3397 = vmatprep.subr.mxu1 %v4838_v41 }
 0x650   : > { %2118 = vmatpush1.msra.mxu0 %v4497_v52  ;;  %3398 = vmatpush3.msra.mxu1 %v4853_v2  ;;  %v1836_v52 = vld [vmem:[#allocation2 + $0x70] sm:$0xff] }
 0x651   : > { %2305 = vmatprep.subr.mxu0 %v4322_v55  ;;  %3399 = vmatprep.subr.mxu1 %v4838_v41 }
 0x652   : > { %3400 = vmatpush3.msra.mxu1 %v4854_v3 }
 0x653   : > { %3404 = vmatprep.subr.mxu1 %v4838_v41 }
 0x6f1   : > { %v1935_v5 = vpop.f32.mrf.mxu0  ;;  %v2036_v7 = vpop.f32.mrf.mxu1 }
 0x6f2   : > { %v1940_v1 = vadd.f32 %v1935_v5, %v1834_v4  ;;  %v2037_v55 = vadd.f32 %v3674_v0, %v2036_v7 }
 0x6f3   : > { %v3368_v8 = vpop.f32.mrf.mxu1  ;;  %v1937_v10 = vpop.f32.mrf.mxu0 }
 0x6f4   : > { %v2893_v6 = vmul.f32 -1.442695, %v1940_v1  ;;  %v1947_v11 = vadd.f32 %v1937_v10, %v1835_v9 }
 0x6f6   : > { %3565 = vpow2.f32 %v2893_v6  ;;  %v2894_v54 = vmul.f32 -1.442695, %v1947_v11 }
 0x6f8   : > { %3567 = vpow2.f32 %v2894_v54 }
 0x703   : > { %v3566_v56 = vpop.eup %3565 }
 0x704   : > { %v1944_v60 = vadd.f32 1.0, %v3566_v56  ;;  %v2053_v56 = vld [vmem:[#allocation2 + $0xa8] sm:$0xff] }
 0x705   : > { %v3568_v61 = vpop.eup %3567 }
 0x706   : > { %3569 = vrcp.f32 %v1944_v60  ;;  %v1951_v49 = vadd.f32 1.0, %v3568_v61 }
 0x713   : > { %v3570_v3 = vpop.eup %3569 }
 0x714   : > { %v2040_v51 = vmul.f32 %v3570_v3, %v2037_v55  ;;  %v4855_v55 = vld [vmem:[#allocation5_spill] sm:$0xff]  ;;  %v2052_v3 = vld [vmem:[#allocation2 + $0xa0] sm:$0xff] }
 0x716   : > { %v2041_v2 = vadd.f32 %v2040_v51, %v1836_v52  ;;  %v4857_v51 = vld [vmem:[#allocation6_spill] sm:$0xff]  ;;  %v4858_v52 = vld [vmem:[#allocation7_spill] sm:$0xff] }
 0x718   : > { %3571 = vtanh.f32 %v2041_v2  ;;  %v4860_v2 = vld [vmem:[#allocation4_spill] sm:$0xff] }
 0x719   : > { %3573 = vrcp.f32 %v1951_v49  ;;  %v4856_v49 = vld [vmem:[#allocation8_spill] sm:$0xff] }
 0x725   : > { %v3572_v4 = vpop.eup %3571 }
 0x726   : > { %v2043_v5 = vsub.f32 %v4512_v63, %v3572_v4  ;;  %v3574_v1 = vpop.eup %3573  ;;  %v4859_v63 = vld [vmem:[#allocation9_spill] sm:$0xff] }
 0x728   : > { %v2044_v8 = vmul.f32 %v3574_v1, %v2043_v5 }
 0x72a   : > { %v4598_v6 = vadd.f32 %v3572_v4, %v2044_v8 }
 0x72c   : > { %2048 = vst [vmem:[#allocation3 + $0x10] sm:$0xff] %v4598_v6  ;;  %2152 = vmatmul.mubr.f32.vlgmr.msra.gmra.mxu0 %v4598_v6  ;;  %3402 = vmatmul.mubr.f32.vlgmr.msra.gmra.mxu1 %v4598_v6 }
 0x72d   : > { %2306 = vmatpush1.msra.mxu0 %v4326_v13  ;;  %3405 = vmatpush3.msra.mxu1 %v4553_v12 }
 0x72e   : > { %2307 = vmatprep.subr.mxu0 %v4330_v58  ;;  %3406 = vmatprep.subr.mxu1 %v4838_v41 }
 0x72f   : > { %2308 = vmatpush1.msra.mxu0 %v4334_v57  ;;  %3407 = vmatpush3.msra.mxu1 %v4558_v50 }
 0x730   : > { %2309 = vmatprep.subr.mxu0 %v4338_v62  ;;  %3408 = vmatprep.subr.mxu1 %v4838_v41 }
 0x731   : > { %2310 = vmatpush1.msra.mxu0 %v4342_v14  ;;  %3409 = vmatpush3.msra.mxu1 %v4563_v53 }
 0x732   : > { %2311 = vmatprep.subr.mxu0 %v4346_v15  ;;  %3410 = vmatprep.subr.mxu1 %v4838_v41 }
 0x733   : > { %2312 = vmatpush1.msra.mxu0 %v4350_v16  ;;  %3411 = vmatpush3.msra.mxu1 %v4568_v59 }
 0x734   : > { %2313 = vmatprep.subr.mxu0 %v4354_v17  ;;  %3412 = vmatprep.subr.mxu1 %v4838_v41 }
 0x735   : > { %2314 = vmatpush1.msra.mxu0 %v4358_v18  ;;  %3413 = vmatpush3.msra.mxu1 %v4361_v19 }
 0x736   : > { %2315 = vmatprep.subr.mxu0 %v4366_v20  ;;  %3414 = vmatprep.subr.mxu1 %v4838_v41 }
 0x737   : > { %2316 = vmatpush1.msra.mxu0 %v4371_v22  ;;  %3415 = vmatpush3.msra.mxu1 %v4374_v23 }
 0x738   : > { %2317 = vmatprep.subr.mxu0 %v4379_v24  ;;  %3416 = vmatprep.subr.mxu1 %v4838_v41 }
 0x739   : > { %2318 = vmatpush1.msra.mxu0 %v4384_v25  ;;  %3417 = vmatpush3.msra.mxu1 %v4387_v31 }
 0x73a   : > { %2319 = vmatprep.subr.mxu0 %v4390_v45  ;;  %3418 = vmatprep.subr.mxu1 %v4838_v41 }
 0x73b   : > { %2320 = vmatpush1.msra.mxu0 %v4395_v21  ;;  %3419 = vmatpush3.msra.mxu1 %v4398_v35 }
 0x73c   : > { %2321 = vmatprep.subr.mxu0 %v4401_v39  ;;  %3420 = vmatprep.subr.mxu1 %v4838_v41 }
 0x73d   : > { %2322 = vmatpush1.msra.mxu0 %v4406_v40  ;;  %3421 = vmatpush3.msra.mxu1 %v4409_v27 }
 0x73e   : > { %2323 = vmatprep.subr.mxu0 %v4414_v28  ;;  %3422 = vmatprep.subr.mxu1 %v4838_v41 }
 0x73f   : > { %2324 = vmatpush1.msra.mxu0 %v4419_v29  ;;  %3423 = vmatpush3.msra.mxu1 %v4422_v30 }
 0x740   : > { %2325 = vmatprep.subr.mxu0 %v4427_v34  ;;  %3424 = vmatprep.subr.mxu1 %v4838_v41 }
 0x741   : > { %2326 = vmatpush1.msra.mxu0 %v4432_v26  ;;  %3425 = vmatpush3.msra.mxu1 %v4435_v32 }
 0x742   : > { %2327 = vmatprep.subr.mxu0 %v4440_v33  ;;  %3426 = vmatprep.subr.mxu1 %v4838_v41 }
 0x743   : > { %2328 = vmatpush1.msra.mxu0 %v4445_v36  ;;  %3427 = vmatpush3.msra.mxu1 %v4448_v37 }
 0x744   : > { %2329 = vmatprep.subr.mxu0 %v4453_v38  ;;  %3428 = vmatprep.subr.mxu1 %v4838_v41 }
 0x745   : > { %2330 = vmatpush1.msra.mxu0 %v4458_v42  ;;  %3429 = vmatpush3.msra.mxu1 %v4461_v43 }
 0x746   : > { %2331 = vmatprep.subr.mxu0 %v4466_v44  ;;  %3430 = vmatprep.subr.mxu1 %v4838_v41 }
 0x747   : > { %2332 = vmatpush1.msra.mxu0 %v4471_v46  ;;  %3431 = vmatpush3.msra.mxu1 %v4474_v47 }
 0x748   : > { %2333 = vmatprep.subr.mxu0 %v4479_v48  ;;  %3432 = vmatprep.subr.mxu1 %v4838_v41 }
 0x749   : > { %2334 = vmatpush1.msra.mxu0 %v4855_v55  ;;  %3433 = vmatpush3.msra.mxu1 %v4856_v49 }
 0x74a   : > { %2335 = vmatprep.subr.mxu0 %v4857_v51  ;;  %3434 = vmatprep.subr.mxu1 %v4838_v41 }
 0x74b   : > { %2336 = vmatpush1.msra.mxu0 %v4858_v52  ;;  %2369 = vmatprep.mubr.f32.mxu0 %v4838_v41  ;;  %v2054_v52 = vld [vmem:[#allocation2 + $0x68] sm:$0xff] }
 0x74c   : > { %3435 = vmatpush3.msra.mxu1 %v4859_v63  ;;  %3436 = vmatprep.mubr.msk.f32.mxu1 %vm3616_vm0, %v4838_v41 }
 0x74d   : > { %2523 = vmatprep.subr.mxu0 %v4860_v2  ;;  %3439 = vmatprep.subr.mxu1 %v4838_v41 }
 0x7ec   : > { %v2153_v7 = vpop.f32.mrf.mxu0  ;;  %v2254_v9 = vpop.f32.mrf.mxu1 }
 0x7ed   : > { %v2158_v10 = vadd.f32 %v2153_v7, %v2052_v3  ;;  %v2255_v2 = vadd.f32 %v3674_v0, %v2254_v9 }
 0x7ee   : > { %v3403_v11 = vpop.f32.mrf.mxu1  ;;  %v2155_v60 = vpop.f32.mrf.mxu0 }
 0x7ef   : > { %v2895_v54 = vmul.f32 -1.442695, %v2158_v10  ;;  %v2165_v61 = vadd.f32 %v2155_v60, %v2053_v56 }
 0x7f1   : > { %3575 = vpow2.f32 %v2895_v54  ;;  %v2896_v4 = vmul.f32 -1.442695, %v2165_v61 }
 0x7f3   : > { %3577 = vpow2.f32 %v2896_v4 }
 0x7fe   : > { %v3576_v5 = vpop.eup %3575 }
 0x7ff   : > { %v2162_v1 = vadd.f32 1.0, %v3576_v5 }
 0x800   : > { %v3578_v8 = vpop.eup %3577 }
 0x801   : > { %3579 = vrcp.f32 %v2162_v1  ;;  %v2169_v55 = vadd.f32 1.0, %v3578_v8 }
 0x80e   : > { %v3580_v63 = vpop.eup %3579 }
 0x80f   : > { %v2258_v51 = vmul.f32 %v3580_v63, %v2255_v2 }
 0x811   : > { %v2259_v49 = vadd.f32 %v2258_v51, %v2054_v52 }
 0x813   : > { %3581 = vtanh.f32 %v2259_v49 }
 0x814   : > { %3583 = vrcp.f32 %v2169_v55  ;;  %v2490_v55 = vld [vmem:[#allocation2 + $0x8] sm:$0xff] }
 0x820   : > { %v3582_v3 = vpop.eup %3581 }
 0x821   : > { %v2261_v7 = vsub.f32 %v4598_v6, %v3582_v3  ;;  %v3584_v10 = vpop.eup %3583 }
 0x823   : > { %v2262_v11 = vmul.f32 %v3584_v10, %v2261_v7 }
 0x825   : > { %v4672_v54 = vadd.f32 %v3582_v3, %v2262_v11 }
 0x827   : > { %2266 = vst [vmem:[#allocation3 + $0x38] sm:$0xff] %v4672_v54  ;;  %2370 = vmatmul.mubr.f32.vlgmr.msra.gmra.mxu0 %v4672_v54  ;;  %3437 = vmatmul.mubr.f32.vlgmr.msra.gmra.mxu1 %v4672_v54 }
 0x828   : > { %2524 = vmatpush1.msra.mxu0 %v4326_v13  ;;  %3440 = vmatpush3.msra.mxu1 %v4553_v12  ;;  %v4861_v13 = vld [vmem:[#allocation5_spill] sm:$0xff] }
 0x829   : > { %2525 = vmatprep.subr.mxu0 %v4330_v58  ;;  %3441 = vmatprep.subr.mxu1 %v4838_v41  ;;  %v4862_v58 = vld [vmem:[#allocation8_spill] sm:$0xff] }
 0x82a   : > { %2526 = vmatpush1.msra.mxu0 %v4334_v57  ;;  %3442 = vmatpush3.msra.mxu1 %v4558_v50  ;;  %v4863_v57 = vld [vmem:[#allocation6_spill] sm:$0xff] }
 0x82b   : > { %2527 = vmatprep.subr.mxu0 %v4338_v62  ;;  %3443 = vmatprep.subr.mxu1 %v4838_v41  ;;  %v4864_v62 = vld [vmem:[#allocation7_spill] sm:$0xff] }
 0x82c   : > { %2528 = vmatpush1.msra.mxu0 %v4342_v14  ;;  %3444 = vmatpush3.msra.mxu1 %v4563_v53  ;;  %v4865_v14 = vld [vmem:[#allocation9_spill] sm:$0xff] }
 0x82d   : > { %2529 = vmatprep.subr.mxu0 %v4346_v15  ;;  %3445 = vmatprep.subr.mxu1 %v4838_v41  ;;  %v2270_v15 = vld [vmem:[#allocation2 + $0x30] sm:$0xff] }
 0x82e   : > { %2530 = vmatpush1.msra.mxu0 %v4350_v16  ;;  %3446 = vmatpush3.msra.mxu1 %v4568_v59 }
 0x82f   : > { %2531 = vmatprep.subr.mxu0 %v4354_v17  ;;  %3447 = vmatprep.subr.mxu1 %v4838_v41 }
 0x830   : > { %2532 = vmatpush1.msra.mxu0 %v4358_v18  ;;  %3448 = vmatpush3.msra.mxu1 %v4361_v19 }
 0x831   : > { %2533 = vmatprep.subr.mxu0 %v4366_v20  ;;  %3449 = vmatprep.subr.mxu1 %v4838_v41 }
 0x832   : > { %2534 = vmatpush1.msra.mxu0 %v4371_v22  ;;  %3450 = vmatpush3.msra.mxu1 %v4374_v23  ;;  %v2271_v22 = vld [vmem:[#allocation2 + $0x58] sm:$0xff] }
 0x833   : > { %2535 = vmatprep.subr.mxu0 %v4379_v24  ;;  %3451 = vmatprep.subr.mxu1 %v4838_v41 }
 0x834   : > { %2536 = vmatpush1.msra.mxu0 %v4384_v25  ;;  %3452 = vmatpush3.msra.mxu1 %v4387_v31 }
 0x835   : > { %2537 = vmatprep.subr.mxu0 %v4390_v45  ;;  %3453 = vmatprep.subr.mxu1 %v4838_v41 }
 0x836   : > { %2538 = vmatpush1.msra.mxu0 %v4395_v21  ;;  %3454 = vmatpush3.msra.mxu1 %v4398_v35 }
 0x837   : > { %2539 = vmatprep.subr.mxu0 %v4401_v39  ;;  %3455 = vmatprep.subr.mxu1 %v4838_v41 }
 0x838   : > { %2540 = vmatpush1.msra.mxu0 %v4406_v40  ;;  %3456 = vmatpush3.msra.mxu1 %v4409_v27 }
 0x839   : > { %2541 = vmatprep.subr.mxu0 %v4414_v28  ;;  %3457 = vmatprep.subr.mxu1 %v4838_v41 }
 0x83a   : > { %2542 = vmatpush1.msra.mxu0 %v4419_v29  ;;  %3458 = vmatpush3.msra.mxu1 %v4422_v30 }
 0x83b   : > { %2543 = vmatprep.subr.mxu0 %v4427_v34  ;;  %3459 = vmatprep.subr.mxu1 %v4838_v41 }
 0x83c   : > { %2544 = vmatpush1.msra.mxu0 %v4432_v26  ;;  %3460 = vmatpush3.msra.mxu1 %v4435_v32 }
 0x83d   : > { %2545 = vmatprep.subr.mxu0 %v4440_v33  ;;  %3461 = vmatprep.subr.mxu1 %v4838_v41  ;;  %v2488_v33 = vld [vmem:[#allocation2 + $0xb8] sm:$0xff] }
 0x83e   : > { %2546 = vmatpush1.msra.mxu0 %v4445_v36  ;;  %3462 = vmatpush3.msra.mxu1 %v4448_v37 }
 0x83f   : > { %2547 = vmatprep.subr.mxu0 %v4453_v38  ;;  %3463 = vmatprep.subr.mxu1 %v4838_v41 }
 0x840   : > { %2548 = vmatpush1.msra.mxu0 %v4458_v42  ;;  %3464 = vmatpush3.msra.mxu1 %v4461_v43 }
 0x841   : > { %2549 = vmatprep.subr.mxu0 %v4466_v44  ;;  %3465 = vmatprep.subr.mxu1 %v4838_v41  ;;  %v2489_v44 = vld [vmem:[#allocation2 + $0x20] sm:$0xff] }
 0x842   : > { %2550 = vmatpush1.msra.mxu0 %v4471_v46  ;;  %3466 = vmatpush3.msra.mxu1 %v4474_v47 }
 0x843   : > { %2551 = vmatprep.subr.mxu0 %v4479_v48  ;;  %3467 = vmatprep.subr.mxu1 %v4838_v41 }
 0x844   : > { %2552 = vmatpush1.msra.mxu0 %v4861_v13  ;;  %3468 = vmatpush3.msra.mxu1 %v4862_v58 }
 0x845   : > { %2553 = vmatprep.subr.mxu0 %v4863_v57  ;;  %3469 = vmatprep.subr.mxu1 %v4838_v41 }
 0x846   : > { %2554 = vmatpush1.msra.mxu0 %v4864_v62  ;;  %2587 = vmatprep.mubr.f32.mxu0 %v4838_v41 }
 0x847   : > { %3470 = vmatpush3.msra.mxu1 %v4865_v14  ;;  %3471 = vmatprep.mubr.msk.f32.mxu1 %vm3616_vm0, %v4838_v41  ;;  %v2272_v41 = vld [vmem:[#allocation2 + $0x80] sm:$0xff] }
 0x8e7   : > { %v2371_v16 = vpop.f32.mrf.mxu0  ;;  %v2472_v17 = vpop.f32.mrf.mxu1 }
 0x8e8   : > { %v2376_v18 = vadd.f32 %v2371_v16, %v2270_v15  ;;  %v2473_v35 = vadd.f32 %v3674_v0, %v2472_v17 }
 0x8e9   : > { %v3438_v19 = vpop.f32.mrf.mxu1  ;;  %v2373_v23 = vpop.f32.mrf.mxu0 }
 0x8ea   : > { %v2897_v20 = vmul.f32 -1.442695, %v2376_v18  ;;  %v2383_v24 = vadd.f32 %v2373_v23, %v2271_v22 }
 0x8ec   : > { %3585 = vpow2.f32 %v2897_v20  ;;  %v2898_v25 = vmul.f32 -1.442695, %v2383_v24 }
 0x8ee   : > { %3587 = vpow2.f32 %v2898_v25 }
 0x8f9   : > { %v3586_v31 = vpop.eup %3585 }
 0x8fa   : > { %v2380_v45 = vadd.f32 1.0, %v3586_v31 }
 0x8fb   : > { %v3588_v21 = vpop.eup %3587 }
 0x8fc   : > { %3589 = vrcp.f32 %v2380_v45  ;;  %v2387_v28 = vadd.f32 1.0, %v3588_v21 }
 0x909   : > { %v3590_v39 = vpop.eup %3589 }
 0x90a   : > { %v2476_v40 = vmul.f32 %v3590_v39, %v2473_v35 }
 0x90c   : > { %v2477_v27 = vadd.f32 %v2476_v40, %v2272_v41 }
 0x90e   : > { %3591 = vtanh.f32 %v2477_v27 }
 0x90f   : > { %3593 = vrcp.f32 %v2387_v28 }
 0x91b   : > { %v3592_v29 = vpop.eup %3591 }
 0x91c   : > { %v2479_v30 = vsub.f32 %v4672_v54, %v3592_v29  ;;  %v3594_v34 = vpop.eup %3593 }
 0x91e   : > { %v2480_v26 = vmul.f32 %v3594_v34, %v2479_v30 }
 0x920   : > { %v2481_v32 = vadd.f32 %v3592_v29, %v2480_v26 }
 0x922   : > { %2484 = vst [vmem:[#allocation3 + $0x28] sm:$0xff] %v2481_v32  ;;  %2588 = vmatmul.mubr.f32.vlgmr.msra.gmra.mxu0 %v2481_v32  ;;  %3472 = vmatmul.mubr.f32.vlgmr.msra.gmra.mxu1 %v2481_v32 }
 0x9e2   : > { %v2589_v36 = vpop.f32.mrf.mxu0  ;;  %v2690_v37 = vpop.f32.mrf.mxu1 }
 0x9e3   : > { %v2594_v38 = vadd.f32 %v2589_v36, %v2488_v33  ;;  %v2691_v59 = vadd.f32 %v3674_v0, %v2690_v37 }
 0x9e4   : > { %v3473_v42 = vpop.f32.mrf.mxu1  ;;  %v2591_v46 = vpop.f32.mrf.mxu0 }
 0x9e5   : > { %v2899_v43 = vmul.f32 -1.442695, %v2594_v38  ;;  %v2601_v47 = vadd.f32 %v2591_v46, %v2489_v44 }
 0x9e7   : > { %3595 = vpow2.f32 %v2899_v43  ;;  %v2900_v48 = vmul.f32 -1.442695, %v2601_v47 }
 0x9e9   : > { %3597 = vpow2.f32 %v2900_v48 }
 0x9f4   : > { %v3596_v12 = vpop.eup %3595 }
 0x9f5   : > { %v2598_v50 = vadd.f32 1.0, %v3596_v12 }
 0x9f6   : > { %v3598_v53 = vpop.eup %3597 }
 0x9f7   : > { %3599 = vrcp.f32 %v2598_v50  ;;  %v2605_v52 = vadd.f32 1.0, %v3598_v53 }
 0xa04   : > { %v3600_v6 = vpop.eup %3599 }
 0xa05   : > { %v2694_v49 = vmul.f32 %v3600_v6, %v2691_v59 }
 0xa07   : > { %v2695_v51 = vadd.f32 %v2694_v49, %v2490_v55 }
 0xa09   : > { %3601 = vtanh.f32 %v2695_v51 }
 0xa0a   : > { %3603 = vrcp.f32 %v2605_v52 }
 0xa16   : > { %v3602_v63 = vpop.eup %3601 }
 0xa17   : > { %v2697_v9 = vsub.f32 %v2481_v32, %v3602_v63  ;;  %v3604_v56 = vpop.eup %3603 }
 0xa19   : > { %v2698_v60 = vmul.f32 %v3604_v56, %v2697_v9  ;;  %2706 = sbr.rel (%p2901_p6) target bundleno = 2819 (0xb03), region = 60 }
 0xa1b   : > { %v2699_v61 = vadd.f32 %v3602_v63, %v2698_v60 }
 0xa1d   : > { %2702 = vst [vmem:[#allocation3 + $0x18] sm:$0xff] %v2699_v61 }
 0xa1e   : > { %v2722_v0 = vld [vmem:[%s4808_s5 + $0x78] sm:$0xff]  ;;  %v3617_v4 = vmov 0.0   ;;  %v2721_v5 = vld [vmem:[%s4808_s5 + $0x70] sm:$0xff]  ;;  %vm3618_vm1 = vmmov 0   ;;  %v2720_v1 = vld [vmem:[%s4808_s5 + $0x68] sm:$0xff] }
 0xa1f   : > { %3474 = vmatprep.subr.mxu0 %v3617_v4  ;;  %3506 = vmatprep.mubr.msk.f32.mxu0 %vm3618_vm1, %v3617_v4  ;;  %v2719_v8 = vld [vmem:[%s4808_s5 + $0x60] sm:$0xff]  ;;  %v2718_v2 = vld [vmem:[%s4808_s5 + $0x58] sm:$0xff]  ;;  %v2717_v3 = vld [vmem:[%s4808_s5 + $0x50] sm:$0xff] }
 0xa20   : > { %3475 = vmatpush3.msra.mxu0 %v2722_v0  ;;  %v2716_v7 = vld [vmem:[%s4808_s5 + $0x48] sm:$0xff]  ;;  %v2715_v10 = vld [vmem:[%s4808_s5 + $0x40] sm:$0xff]  ;;  %v2714_v11 = vld [vmem:[%s4808_s5 + $0x38] sm:$0xff] }
 0xa21   : > { %3476 = vmatprep.subr.mxu0 %v3617_v4  ;;  %v2713_v54 = vld [vmem:[%s4808_s5 + $0x30] sm:$0xff]  ;;  %v2712_v13 = vld [vmem:[%s4808_s5 + $0x28] sm:$0xff]  ;;  %v2711_v58 = vld [vmem:[%s4808_s5 + $0x20] sm:$0xff] }
 0xa22   : > { %3477 = vmatpush3.msra.mxu0 %v2721_v5  ;;  %v2710_v57 = vld [vmem:[%s4808_s5 + $0x18] sm:$0xff]  ;;  %v2709_v62 = vld [vmem:[%s4808_s5 + $0x10] sm:$0xff]  ;;  %v2708_v14 = vld [vmem:[%s4808_s5 + $0x8] sm:$0xff] }
 0xa23   : > { %3478 = vmatprep.subr.mxu0 %v3617_v4  ;;  %v2707_v15 = vld [vmem:[%s4808_s5] sm:$0xff] }
 0xa24   : > { %3479 = vmatpush3.msra.mxu0 %v2720_v1  ;;  %v2902_v16 = vld [vmem:[%s4809_s6] ss:$0 sm:$0xff] }
 0xa25   : > { %3480 = vmatprep.subr.mxu0 %v3617_v4 }
 0xa26   : > { %3481 = vmatpush3.msra.mxu0 %v2719_v8 }
 0xa27   : > { %3482 = vmatprep.subr.mxu0 %v3617_v4 }
 0xa28   : > { %3483 = vmatpush3.msra.mxu0 %v2718_v2 }
 0xa29   : > { %3484 = vmatprep.subr.mxu0 %v3617_v4 }
 0xa2a   : > { %3485 = vmatpush3.msra.mxu0 %v2717_v3 }
 0xa2b   : > { %3486 = vmatprep.subr.mxu0 %v3617_v4 }
 0xa2c   : > { %3487 = vmatpush3.msra.mxu0 %v2716_v7 }
 0xa2d   : > { %3488 = vmatprep.subr.mxu0 %v3617_v4 }
 0xa2e   : > { %3489 = vmatpush3.msra.mxu0 %v2715_v10 }
 0xa2f   : > { %3490 = vmatprep.subr.mxu0 %v3617_v4 }
 0xa30   : > { %3491 = vmatpush3.msra.mxu0 %v2714_v11 }
 0xa31   : > { %3492 = vmatprep.subr.mxu0 %v3617_v4 }
 0xa32   : > { %3493 = vmatpush3.msra.mxu0 %v2713_v54 }
 0xa33   : > { %3494 = vmatprep.subr.mxu0 %v3617_v4 }
 0xa34   : > { %3495 = vmatpush3.msra.mxu0 %v2712_v13 }
 0xa35   : > { %3496 = vmatprep.subr.mxu0 %v3617_v4 }
 0xa36   : > { %3497 = vmatpush3.msra.mxu0 %v2711_v58 }
 0xa37   : > { %3498 = vmatprep.subr.mxu0 %v3617_v4 }
 0xa38   : > { %3499 = vmatpush3.msra.mxu0 %v2710_v57 }
 0xa39   : > { %3500 = vmatprep.subr.mxu0 %v3617_v4 }
 0xa3a   : > { %3501 = vmatpush3.msra.mxu0 %v2709_v62 }
 0xa3b   : > { %3502 = vmatprep.subr.mxu0 %v3617_v4 }
 0xa3c   : > { %3503 = vmatpush3.msra.mxu0 %v2708_v14 }
 0xa3d   : > { %3504 = vmatprep.subr.mxu0 %v3617_v4 }
 0xa3e   : > { %3505 = vmatpush3.msra.mxu0 %v2707_v15 }
 0xa3f   : > { %3507 = vmatmul.mubr.f32.vlgmr.msra.gmra.mxu0 %v2699_v61 }
 0xaff   : > { %v2796_v17 = vpop.f32.mrf.mxu0 }
 0xb00   : > { %v2797_v18 = vadd.f32 %v2902_v16, %v2796_v17 }
 0xb01   : > { %v3508_v19 = vpop.f32.mrf.mxu0 }
 0xb02   : > { %2800 = vst [vmem:[%s4810_s7] sm:$0xff] %v2797_v18 }
 0xb03 PF: > { %s17_s24 = sadd.s32 1, %s3611_s24  }
 0xb04   : > { %p14_p7 = scmp.ge.s32.totalorder %s17_s24, 4  }
 0xb06   :  { %16 = sbr.rel (!%p14_p7) target bundleno = 1 (0x1), region = 111 }

</bundles_post_ra>
